<compile_context>
chip_gen: v5e
topology: v5e:2x2
jax: 0.10.0
libtpu: 0.0.40
codegen_flags: <defaults>
</compile_context>

<pallas_src>
import jax
import jax.numpy as jnp
from jax.experimental import pallas as pl
from jax.experimental.pallas import tpu as pltpu


def _round_up(x, m):
    return ((x + m - 1) // m) * m


# --------------------------------------------------------------------------
# kernel: one block of B_blk sequences per grid step
# --------------------------------------------------------------------------
def nnet_kernel(feat_ref, eps_ref, w_emb_ref, w_gates_ref, w_head_ref,
                bias_ref, k_ref, xg_ref):
    # feat_ref : [N*B_blk, F_pad]   time-major within the block (rows t*B_blk+j)
    # eps_ref  : [B_blk, 1]
    # w_emb_ref: [F_pad, E]
    # w_gates  : [E+H, 4H]          columns permuted to (i, f, o | g)
    # w_head   : [H, 4H]            lanes 0/1 = mu / log_sigma weights
    # bias_ref : [3, 4H]            row0 b_emb, row1 b_ih+b_hh (permuted), row2 head
    # k_ref    : [B_blk, 128]       lane-dense output slab
    # xg_ref   : VMEM scratch [N, B_blk, 4H]
    N, B_blk, G = xg_ref.shape
    E = w_emb_ref.shape[1]
    H = G // 4
    hp = jax.lax.Precision.HIGHEST

    bias = bias_ref[...]
    b_emb = bias[0:1, 0:E]           # [1, E]
    b_gates = bias[1:2, :]           # [1, 4H]  (b_ih + b_hh, folded & reordered)
    b_head = bias[2:3, :]            # [1, 4H]  (lanes 0/1 = b_mu / b_log_sigma)

    wg = w_gates_ref[...]
    w_ih_t = wg[0:E, :]              # [E, 4H]
    w_hh_t = wg[E:E + H, :]          # [H, 4H]

    # ---- embedding + ReLU for every (sequence, timestep) row at once ----
    feats = feat_ref[...]                                              # [N*B_blk, F]
    x = jnp.dot(feats, w_emb_ref[...], preferred_element_type=jnp.float32,
                precision=hp) + b_emb
    x = jnp.maximum(x, 0.0)                                            # [N*B_blk, E]

    # ---- input-gate contributions for all timesteps in one matmul ----
    xg = jnp.dot(x, w_ih_t, preferred_element_type=jnp.float32,
                 precision=hp) + b_gates                               # [N*B_blk, 4H]
    # Stash per-timestep slabs in VMEM scratch (bounds vreg live ranges).
    for t in range(N):
        xg_ref[t] = xg[t * B_blk:(t + 1) * B_blk, :]

    # ---- LSTM recurrence, whole block at once: [B_blk,H] @ [H,4H] per step ----
    h0 = jnp.zeros((B_blk, H), jnp.float32)
    c0 = jnp.zeros((B_blk, H), jnp.float32)

    def step(t, carry):
        h, c = carry
        g = xg_ref[t] + jnp.dot(h, w_hh_t, preferred_element_type=jnp.float32,
                                precision=hp)                          # [B_blk, 4H]
        s = jax.nn.sigmoid(g[:, 0:3 * H])        # gates i | f | o
        gc = jnp.tanh(g[:, 3 * H:])              # cell candidate
        i_g = s[:, 0:H]
        f_g = s[:, H:2 * H]
        o_g = s[:, 2 * H:3 * H]
        c = f_g * c + i_g * gc
        h = o_g * jnp.tanh(c)
        return h, c

    h, _ = jax.lax.fori_loop(0, N, step, (h0, c0), unroll=True)

    # ---- merged, lane-padded mu / log_sigma head + reparameterized sample ----
    head = jnp.dot(h, w_head_ref[...], preferred_element_type=jnp.float32,
                   precision=hp) + b_head                              # [B_blk, 4H]
    mu = head[:, 0:1]                                                  # [B_blk, 1]
    sigma = jnp.exp(head[:, 1:2])                                      # [B_blk, 1]
    k_raw = mu + sigma * eps_ref[...]            # eps == 0 reproduces sample=False
    k = 0.5 * (jnp.tanh(k_raw) + 1.0)                                  # [B_blk, 1]
    k_ref[...] = jnp.broadcast_to(k, k_ref.shape)                      # lane-dense store


# --------------------------------------------------------------------------
# wrappers
# --------------------------------------------------------------------------
def nnet_forward_batch(features_b, packed, *, sample=True, key=None, block_b=128):
    """features_b: [B, N, F] float32 -> k: [B] in [0,1].  B_blk sequences are
    processed per grid step; the grid axis is 'parallel' (megacore)."""
    B, N, F = features_b.shape
    assert F == packed["feat_dim"]
    F_pad = packed["feat_dim_pad"]
    G = packed["w_gates_t"].shape[1]

    B_blk = min(_round_up(block_b, 8), _round_up(B, 8))
    B_pad = _round_up(B, B_blk)
    num_blocks = B_pad // B_blk

    if sample:
        assert key is not None, "sample=True requires a PRNG key"
        eps = jax.random.normal(key, (B,), dtype=jnp.float32)
    else:
        eps = jnp.zeros((B,), dtype=jnp.float32)

    # Zero-pad batch (discarded rows) and feature dim (zero weights => exact),
    # then re-layout so each grid step gets one contiguous, time-major,
    # lane-dense [N*B_blk, F_pad] slab.
    f = jnp.pad(features_b.astype(jnp.float32),
                ((0, B_pad - B), (0, 0), (0, F_pad - F)))
    f = f.reshape(num_blocks, B_blk, N, F_pad).transpose(0, 2, 1, 3)
    f = f.reshape(num_blocks, N * B_blk, F_pad)
    eps_p = jnp.pad(eps, (0, B_pad - B)).reshape(B_pad, 1)

    def resident(a):   # full-array block, constant index_map -> loaded once
        return pl.BlockSpec(a.shape, lambda g: (0, 0))

    out = pl.pallas_call(
        nnet_kernel,
        out_shape=jax.ShapeDtypeStruct((B_pad, 128), jnp.float32),
        grid=(num_blocks,),
        in_specs=[
            pl.BlockSpec((None, N * B_blk, F_pad), lambda g: (g, 0, 0)),
            pl.BlockSpec((B_blk, 1), lambda g: (g, 0)),
            resident(packed["w_emb_t"]),
            resident(packed["w_gates_t"]),
            resident(packed["w_head"]),
            resident(packed["bias_pack"]),
        ],
        out_specs=pl.BlockSpec((B_blk, 128), lambda g: (g, 0)),
        scratch_shapes=[pltpu.VMEM((N, B_blk, G), jnp.float32)],
        compiler_params=pltpu.CompilerParams(
            dimension_semantics=("parallel",)),
    )(f, eps_p, packed["w_emb_t"], packed["w_gates_t"], packed["w_head"],
      packed["bias_pack"])
    return out[:B, 0]


def nnet_forward(features, packed, *, sample=True, key=None):
    """Single sequence [N, F] -> k with shape [1] (like the PyTorch module).
    Routed through the batched path (single grid step)."""
    return nnet_forward_batch(features[None], packed, sample=sample, key=key)


# --------------------------------------------------------------------------
# parameter construction (PyTorch-convention shapes) + one-time packing
# --------------------------------------------------------------------------
def init_params(key, input_dim, embed_dim, lstm_hidden_dim):
    ks = jax.random.split(key, 10)

    def u(k, shape, fan):
        b = 1.0 / jnp.sqrt(jnp.float32(fan))
        return jax.random.uniform(k, shape, jnp.float32, -b, b)

    H = lstm_hidden_dim
    return {
        "w_emb": u(ks[0], (embed_dim, input_dim), input_dim),
        "b_emb": u(ks[1], (1, embed_dim), input_dim),
        "w_ih": u(ks[2], (4 * H, embed_dim), H),   # PyTorch gate order (i,f,g,o)
        "b_ih": u(ks[3], (1, 4 * H), H),
        "w_hh": u(ks[4], (4 * H, H), H),
        "b_hh": u(ks[5], (1, 4 * H), H),
        "w_mu": u(ks[6], (1, H), H),
        "b_mu": u(ks[7], (1, 1), H),
        "w_ls": u(ks[8], (1, H), H),
        "b_ls": u(ks[9], (1, 1), H),
    }


def pack_params(p):
    """One-time, exact re-layout of the PyTorch-shaped parameters."""
    E, F = p["w_emb"].shape
    H = p["w_hh"].shape[1]
    G = 4 * H
    assert G >= E and G >= 2, "bias/head packing assumes 4H >= embed_dim and >= 2"
    F_pad = _round_up(F, 8)

    def reorder_cols(w):   # gate columns (i,f,g,o) -> (i,f,o,g)
        return jnp.concatenate([w[:, :2 * H], w[:, 3 * H:], w[:, 2 * H:3 * H]], axis=1)

    w_emb_t = jnp.zeros((F_pad, E), jnp.float32).at[:F, :].set(p["w_emb"].T)
    w_gates_t = jnp.concatenate([reorder_cols(p["w_ih"].T),
                                 reorder_cols(p["w_hh"].T)], axis=0)      # [E+H, 4H]
    w_head = (jnp.zeros((H, G), jnp.float32)
              .at[:, 0:1].set(p["w_mu"].T)
              .at[:, 1:2].set(p["w_ls"].T))                               # [H, 4H]

    b_emb_row = jnp.zeros((1, G), jnp.float32).at[:, :E].set(p["b_emb"])
    b_gates_row = reorder_cols(p["b_ih"] + p["b_hh"])                     # exact fold
    b_head_row = (jnp.zeros((1, G), jnp.float32)
                  .at[0, 0].set(p["b_mu"][0, 0])
                  .at[0, 1].set(p["b_ls"][0, 0]))
    bias_pack = jnp.concatenate([b_emb_row, b_gates_row, b_head_row], axis=0)

    return {"w_emb_t": w_emb_t, "w_gates_t": w_gates_t, "w_head": w_head,
            "bias_pack": bias_pack, "feat_dim": F, "feat_dim_pad": F_pad}


# --------------------------------------------------------------------------
# pure-JAX reference (PyTorch layout / gate order) for correctness checks
# --------------------------------------------------------------------------
def nnet_reference_batch(features_b, p, eps_b):
    hp = jax.lax.Precision.HIGHEST
    B, N, _ = features_b.shape
    H = p["w_hh"].shape[1]
    x = jnp.maximum(
        jnp.einsum("bnf,ef->bne", features_b, p["w_emb"], precision=hp) + p["b_emb"],
        0.0)
    h = jnp.zeros((B, H), jnp.float32)
    c = jnp.zeros((B, H), jnp.float32)
    for t in range(N):
        g = (jnp.dot(x[:, t, :], p["w_ih"].T, precision=hp) + p["b_ih"]
             + jnp.dot(h, p["w_hh"].T, precision=hp) + p["b_hh"])
        i = jax.nn.sigmoid(g[:, 0:H])
        f = jax.nn.sigmoid(g[:, H:2 * H])
        gg = jnp.tanh(g[:, 2 * H:3 * H])
        o = jax.nn.sigmoid(g[:, 3 * H:4 * H])
        c = f * c + i * gg
        h = o * jnp.tanh(c)
    mu = (jnp.dot(h, p["w_mu"].T, precision=hp) + p["b_mu"])[:, 0]
    log_sigma = (jnp.dot(h, p["w_ls"].T, precision=hp) + p["b_ls"])[:, 0]
    k_raw = mu + jnp.exp(log_sigma) * eps_b
    return 0.5 * (jnp.tanh(k_raw) + 1.0)


# --------------------------------------------------------------------------
if __name__ == "__main__":
    # args = {'inputs_type': 'only_features', 'embed_dim': 32, 'lstm_hidden_dim': 32}
    N, INPUT_DIM, EMBED_DIM, LSTM_HIDDEN = 8, 17, 32, 32
    B = 96

    root = jax.random.PRNGKey(0)
    k_params, k_feat, k_featb, k_eps = jax.random.split(root, 4)

    raw = init_params(k_params, INPUT_DIM, EMBED_DIM, LSTM_HIDDEN)
    packed = pack_params(raw)

    features = jax.random.normal(k_feat, (N, INPUT_DIM), dtype=jnp.float32)
    features_b = jax.random.normal(k_featb, (B, N, INPUT_DIM), dtype=jnp.float32)

    # sample=False path (k = 0.5*(tanh(mu)+1)), single sequence
    k_det = nnet_forward(features, packed, sample=False)
    # sample=True path (reparameterized), deterministic via PRNG key
    k_smp = nnet_forward(features, packed, sample=True, key=k_eps)
    # batched path: block_b=64 -> 2 grid steps (exercises megacore + padding)
    k_batch = nnet_forward_batch(features_b, packed, sample=False, block_b=64)
    jax.block_until_ready((k_det, k_smp, k_batch))

    # cross-check against the pure-JAX fp32 reference
    ref_det = nnet_reference_batch(features[None], raw, jnp.zeros((1,), jnp.float32))
    eps1 = jax.random.normal(k_eps, (1,), dtype=jnp.float32)   # same draw as wrapper
    ref_smp = nnet_reference_batch(features[None], raw, eps1)
    ref_batch = nnet_reference_batch(features_b, raw, jnp.zeros((B,), jnp.float32))

    assert k_det.shape == (1,) and k_smp.shape == (1,) and k_batch.shape == (B,)
    assert bool(jnp.all((k_batch >= 0.0) & (k_batch <= 1.0)))
    assert bool(jnp.allclose(k_det, ref_det, atol=1e-4, rtol=1e-4))
    assert bool(jnp.allclose(k_smp, ref_smp, atol=1e-4, rtol=1e-4))
    assert bool(jnp.allclose(k_batch, ref_batch, atol=1e-4, rtol=1e-4))

    print("KERNEL_OK")
</pallas_src>

<mosaic_0001>
module attributes {stable_mosaic.version = 11 : i64} {
  func.func @nnet_kernel(%arg0: i32, %arg1: memref<1x64x24xf32, #tpu.memory_space<vmem>>, %arg2: memref<8x1xf32, #tpu.memory_space<vmem>>, %arg3: memref<24x32xf32, #tpu.memory_space<vmem>>, %arg4: memref<64x128xf32, #tpu.memory_space<vmem>>, %arg5: memref<32x128xf32, #tpu.memory_space<vmem>>, %arg6: memref<3x128xf32, #tpu.memory_space<vmem>>, %arg7: memref<8x128xf32, #tpu.memory_space<vmem>>, %arg8: memref<8x8x128xf32, #tpu.memory_space<vmem>>) attributes {dimension_semantics = [#tpu.dimension_semantics<parallel>], iteration_bounds = array<i64: 1>, scalar_prefetch = 0 : i64, scratch_operands = 1 : i64, tpu.core_type = #tpu.core_type<tc>, window_params = [{transform_indices = @transform_0, window_bounds = array<i64: 1, 64, 24>}, {transform_indices = @transform_1, window_bounds = array<i64: 8, 1>}, {pipeline_mode = #tpu.pipeline_mode<synchronous>, transform_indices = @transform_2, window_bounds = array<i64: 24, 32>}, {pipeline_mode = #tpu.pipeline_mode<synchronous>, transform_indices = @transform_3, window_bounds = array<i64: 64, 128>}, {pipeline_mode = #tpu.pipeline_mode<synchronous>, transform_indices = @transform_4, window_bounds = array<i64: 32, 128>}, {pipeline_mode = #tpu.pipeline_mode<synchronous>, transform_indices = @transform_5, window_bounds = array<i64: 3, 128>}, {transform_indices = @transform_6, window_bounds = array<i64: 8, 128>}]} {
    %c0 = arith.constant 0 : index
    %c0_0 = arith.constant 0 : index
    %0 = vector.load %arg6[%c0, %c0_0] : memref<3x128xf32, #tpu.memory_space<vmem>>, vector<3x128xf32>
    %1 = vector.extract_strided_slice %0 {offsets = [0, 0], sizes = [1, 32], strides = [1, 1]} : vector<3x128xf32> to vector<1x32xf32>
    %2 = vector.extract_strided_slice %0 {offsets = [1, 0], sizes = [1, 128], strides = [1, 1]} : vector<3x128xf32> to vector<1x128xf32>
    %3 = vector.extract_strided_slice %0 {offsets = [2, 0], sizes = [1, 128], strides = [1, 1]} : vector<3x128xf32> to vector<1x128xf32>
    %c0_1 = arith.constant 0 : index
    %c0_2 = arith.constant 0 : index
    %4 = vector.load %arg4[%c0_1, %c0_2] : memref<64x128xf32, #tpu.memory_space<vmem>>, vector<64x128xf32>
    %5 = vector.extract_strided_slice %4 {offsets = [0, 0], sizes = [32, 128], strides = [1, 1]} : vector<64x128xf32> to vector<32x128xf32>
    %6 = vector.extract_strided_slice %4 {offsets = [32, 0], sizes = [32, 128], strides = [1, 1]} : vector<64x128xf32> to vector<32x128xf32>
    %c0_3 = arith.constant 0 : index
    %c0_4 = arith.constant 0 : index
    %c0_5 = arith.constant 0 : index
    %7 = vector.load %arg1[%c0_3, %c0_4, %c0_5] : memref<1x64x24xf32, #tpu.memory_space<vmem>>, vector<1x64x24xf32>
    %8 = vector.shape_cast %7 : vector<1x64x24xf32> to vector<64x24xf32>
    %c0_6 = arith.constant 0 : index
    %c0_7 = arith.constant 0 : index
    %9 = vector.load %arg3[%c0_6, %c0_7] : memref<24x32xf32, #tpu.memory_space<vmem>>, vector<24x32xf32>
    %cst = arith.constant dense<0.000000e+00> : vector<64x32xf32>
    %10 = tpu.matmul %8, %9, %cst {dimension_numbers = #tpu.dot_dimension_numbers<[1], [0], [0], [1], [0, 0, 1, 1], [], []>, precision = #tpu.contract_precision<fp32>} : vector<64x24xf32>, vector<24x32xf32>, vector<64x32xf32> -> vector<64x32xf32>
    %11 = vector.broadcast %1 : vector<1x32xf32> to vector<64x32xf32>
    %12 = arith.addf %10, %11 : vector<64x32xf32>
    %cst_8 = arith.constant 0.000000e+00 : f32
    %13 = vector.broadcast %cst_8 : f32 to vector<64x32xf32>
    %14 = arith.maximumf %12, %13 : vector<64x32xf32>
    %cst_9 = arith.constant dense<0.000000e+00> : vector<64x128xf32>
    %15 = tpu.matmul %14, %5, %cst_9 {dimension_numbers = #tpu.dot_dimension_numbers<[1], [0], [0], [1], [0, 0, 1, 1], [], []>, precision = #tpu.contract_precision<fp32>} : vector<64x32xf32>, vector<32x128xf32>, vector<64x128xf32> -> vector<64x128xf32>
    %16 = vector.broadcast %2 : vector<1x128xf32> to vector<64x128xf32>
    %17 = arith.addf %15, %16 : vector<64x128xf32>
    %18 = vector.extract_strided_slice %17 {offsets = [0, 0], sizes = [8, 128], strides = [1, 1]} : vector<64x128xf32> to vector<8x128xf32>
    %c0_10 = arith.constant 0 : index
    %c0_11 = arith.constant 0 : index
    %c0_12 = arith.constant 0 : index
    %19 = vector.load %arg8[%c0_10, %c0_11, %c0_12] : memref<8x8x128xf32, #tpu.memory_space<vmem>>, vector<1x8x128xf32>
    %20 = vector.shape_cast %19 : vector<1x8x128xf32> to vector<8x128xf32>
    %21 = vector.shape_cast %18 : vector<8x128xf32> to vector<1x8x128xf32>
    tpu.vector_store %arg8[%c0_10, %c0_11, %c0_12], %21 {strides = array<i32>} : memref<8x8x128xf32, #tpu.memory_space<vmem>>, vector<1x8x128xf32>,
    %22 = vector.extract_strided_slice %17 {offsets = [8, 0], sizes = [8, 128], strides = [1, 1]} : vector<64x128xf32> to vector<8x128xf32>
    %c1 = arith.constant 1 : index
    %c0_13 = arith.constant 0 : index
    %c0_14 = arith.constant 0 : index
    %23 = vector.load %arg8[%c1, %c0_13, %c0_14] : memref<8x8x128xf32, #tpu.memory_space<vmem>>, vector<1x8x128xf32>
    %24 = vector.shape_cast %23 : vector<1x8x128xf32> to vector<8x128xf32>
    %25 = vector.shape_cast %22 : vector<8x128xf32> to vector<1x8x128xf32>
    tpu.vector_store %arg8[%c1, %c0_13, %c0_14], %25 {strides = array<i32>} : memref<8x8x128xf32, #tpu.memory_space<vmem>>, vector<1x8x128xf32>,
    %26 = vector.extract_strided_slice %17 {offsets = [16, 0], sizes = [8, 128], strides = [1, 1]} : vector<64x128xf32> to vector<8x128xf32>
    %c2 = arith.constant 2 : index
    %c0_15 = arith.constant 0 : index
    %c0_16 = arith.constant 0 : index
    %27 = vector.load %arg8[%c2, %c0_15, %c0_16] : memref<8x8x128xf32, #tpu.memory_space<vmem>>, vector<1x8x128xf32>
    %28 = vector.shape_cast %27 : vector<1x8x128xf32> to vector<8x128xf32>
    %29 = vector.shape_cast %26 : vector<8x128xf32> to vector<1x8x128xf32>
    tpu.vector_store %arg8[%c2, %c0_15, %c0_16], %29 {strides = array<i32>} : memref<8x8x128xf32, #tpu.memory_space<vmem>>, vector<1x8x128xf32>,
    %30 = vector.extract_strided_slice %17 {offsets = [24, 0], sizes = [8, 128], strides = [1, 1]} : vector<64x128xf32> to vector<8x128xf32>
    %c3 = arith.constant 3 : index
    %c0_17 = arith.constant 0 : index
    %c0_18 = arith.constant 0 : index
    %31 = vector.load %arg8[%c3, %c0_17, %c0_18] : memref<8x8x128xf32, #tpu.memory_space<vmem>>, vector<1x8x128xf32>
    %32 = vector.shape_cast %31 : vector<1x8x128xf32> to vector<8x128xf32>
    %33 = vector.shape_cast %30 : vector<8x128xf32> to vector<1x8x128xf32>
    tpu.vector_store %arg8[%c3, %c0_17, %c0_18], %33 {strides = array<i32>} : memref<8x8x128xf32, #tpu.memory_space<vmem>>, vector<1x8x128xf32>,
    %34 = vector.extract_strided_slice %17 {offsets = [32, 0], sizes = [8, 128], strides = [1, 1]} : vector<64x128xf32> to vector<8x128xf32>
    %c4 = arith.constant 4 : index
    %c0_19 = arith.constant 0 : index
    %c0_20 = arith.constant 0 : index
    %35 = vector.load %arg8[%c4, %c0_19, %c0_20] : memref<8x8x128xf32, #tpu.memory_space<vmem>>, vector<1x8x128xf32>
    %36 = vector.shape_cast %35 : vector<1x8x128xf32> to vector<8x128xf32>
    %37 = vector.shape_cast %34 : vector<8x128xf32> to vector<1x8x128xf32>
    tpu.vector_store %arg8[%c4, %c0_19, %c0_20], %37 {strides = array<i32>} : memref<8x8x128xf32, #tpu.memory_space<vmem>>, vector<1x8x128xf32>,
    %38 = vector.extract_strided_slice %17 {offsets = [40, 0], sizes = [8, 128], strides = [1, 1]} : vector<64x128xf32> to vector<8x128xf32>
    %c5 = arith.constant 5 : index
    %c0_21 = arith.constant 0 : index
    %c0_22 = arith.constant 0 : index
    %39 = vector.load %arg8[%c5, %c0_21, %c0_22] : memref<8x8x128xf32, #tpu.memory_space<vmem>>, vector<1x8x128xf32>
    %40 = vector.shape_cast %39 : vector<1x8x128xf32> to vector<8x128xf32>
    %41 = vector.shape_cast %38 : vector<8x128xf32> to vector<1x8x128xf32>
    tpu.vector_store %arg8[%c5, %c0_21, %c0_22], %41 {strides = array<i32>} : memref<8x8x128xf32, #tpu.memory_space<vmem>>, vector<1x8x128xf32>,
    %42 = vector.extract_strided_slice %17 {offsets = [48, 0], sizes = [8, 128], strides = [1, 1]} : vector<64x128xf32> to vector<8x128xf32>
    %c6 = arith.constant 6 : index
    %c0_23 = arith.constant 0 : index
    %c0_24 = arith.constant 0 : index
    %43 = vector.load %arg8[%c6, %c0_23, %c0_24] : memref<8x8x128xf32, #tpu.memory_space<vmem>>, vector<1x8x128xf32>
    %44 = vector.shape_cast %43 : vector<1x8x128xf32> to vector<8x128xf32>
    %45 = vector.shape_cast %42 : vector<8x128xf32> to vector<1x8x128xf32>
    tpu.vector_store %arg8[%c6, %c0_23, %c0_24], %45 {strides = array<i32>} : memref<8x8x128xf32, #tpu.memory_space<vmem>>, vector<1x8x128xf32>,
    %46 = vector.extract_strided_slice %17 {offsets = [56, 0], sizes = [8, 128], strides = [1, 1]} : vector<64x128xf32> to vector<8x128xf32>
    %c7 = arith.constant 7 : index
    %c0_25 = arith.constant 0 : index
    %c0_26 = arith.constant 0 : index
    %47 = vector.load %arg8[%c7, %c0_25, %c0_26] : memref<8x8x128xf32, #tpu.memory_space<vmem>>, vector<1x8x128xf32>
    %48 = vector.shape_cast %47 : vector<1x8x128xf32> to vector<8x128xf32>
    %49 = vector.shape_cast %46 : vector<8x128xf32> to vector<1x8x128xf32>
    tpu.vector_store %arg8[%c7, %c0_25, %c0_26], %49 {strides = array<i32>} : memref<8x8x128xf32, #tpu.memory_space<vmem>>, vector<1x8x128xf32>,
    %cst_27 = arith.constant 0.000000e+00 : f32
    %50 = vector.broadcast %cst_27 : f32 to vector<8x32xf32>
    %cst_28 = arith.constant 0.000000e+00 : f32
    %51 = vector.broadcast %cst_28 : f32 to vector<8x32xf32>
    %c0_i32 = arith.constant 0 : i32
    %52 = arith.index_cast %c0_i32 : i32 to index
    %c0_29 = arith.constant 0 : index
    %c0_30 = arith.constant 0 : index
    %53 = vector.load %arg8[%52, %c0_29, %c0_30] : memref<8x8x128xf32, #tpu.memory_space<vmem>>, vector<1x8x128xf32>
    %54 = vector.shape_cast %53 : vector<1x8x128xf32> to vector<8x128xf32>
    %cst_31 = arith.constant dense<0.000000e+00> : vector<8x128xf32>
    %55 = tpu.matmul %50, %6, %cst_31 {dimension_numbers = #tpu.dot_dimension_numbers<[1], [0], [0], [1], [0, 0, 1, 1], [], []>, precision = #tpu.contract_precision<fp32>} : vector<8x32xf32>, vector<32x128xf32>, vector<8x128xf32> -> vector<8x128xf32>
    %56 = arith.addf %54, %55 : vector<8x128xf32>
    %57 = vector.extract_strided_slice %56 {offsets = [0, 0], sizes = [8, 96], strides = [1, 1]} : vector<8x128xf32> to vector<8x96xf32>
    %58 = arith.negf %57 : vector<8x96xf32>
    %59 = math.exp %58 : vector<8x96xf32>
    %cst_32 = arith.constant 1.000000e+00 : f32
    %60 = vector.broadcast %cst_32 : f32 to vector<8x96xf32>
    %61 = arith.addf %60, %59 : vector<8x96xf32>
    %62 = arith.divf %60, %61 : vector<8x96xf32>
    %63 = vector.extract_strided_slice %56 {offsets = [0, 96], sizes = [8, 32], strides = [1, 1]} : vector<8x128xf32> to vector<8x32xf32>
    %64 = math.tanh %63 : vector<8x32xf32>
    %65 = vector.extract_strided_slice %62 {offsets = [0, 0], sizes = [8, 32], strides = [1, 1]} : vector<8x96xf32> to vector<8x32xf32>
    %66 = vector.extract_strided_slice %62 {offsets = [0, 32], sizes = [8, 32], strides = [1, 1]} : vector<8x96xf32> to vector<8x32xf32>
    %67 = vector.extract_strided_slice %62 {offsets = [0, 64], sizes = [8, 32], strides = [1, 1]} : vector<8x96xf32> to vector<8x32xf32>
    %68 = arith.mulf %66, %51 : vector<8x32xf32>
    %69 = arith.mulf %65, %64 : vector<8x32xf32>
    %70 = arith.addf %68, %69 : vector<8x32xf32>
    %71 = math.tanh %70 : vector<8x32xf32>
    %72 = arith.mulf %67, %71 : vector<8x32xf32>
    %c1_i32 = arith.constant 1 : i32
    %73 = arith.index_cast %c1_i32 : i32 to index
    %c0_33 = arith.constant 0 : index
    %c0_34 = arith.constant 0 : index
    %74 = vector.load %arg8[%73, %c0_33, %c0_34] : memref<8x8x128xf32, #tpu.memory_space<vmem>>, vector<1x8x128xf32>
    %75 = vector.shape_cast %74 : vector<1x8x128xf32> to vector<8x128xf32>
    %cst_35 = arith.constant dense<0.000000e+00> : vector<8x128xf32>
    %76 = tpu.matmul %72, %6, %cst_35 {dimension_numbers = #tpu.dot_dimension_numbers<[1], [0], [0], [1], [0, 0, 1, 1], [], []>, precision = #tpu.contract_precision<fp32>} : vector<8x32xf32>, vector<32x128xf32>, vector<8x128xf32> -> vector<8x128xf32>
    %77 = arith.addf %75, %76 : vector<8x128xf32>
    %78 = vector.extract_strided_slice %77 {offsets = [0, 0], sizes = [8, 96], strides = [1, 1]} : vector<8x128xf32> to vector<8x96xf32>
    %79 = arith.negf %78 : vector<8x96xf32>
    %80 = math.exp %79 : vector<8x96xf32>
    %cst_36 = arith.constant 1.000000e+00 : f32
    %81 = vector.broadcast %cst_36 : f32 to vector<8x96xf32>
    %82 = arith.addf %81, %80 : vector<8x96xf32>
    %83 = arith.divf %81, %82 : vector<8x96xf32>
    %84 = vector.extract_strided_slice %77 {offsets = [0, 96], sizes = [8, 32], strides = [1, 1]} : vector<8x128xf32> to vector<8x32xf32>
    %85 = math.tanh %84 : vector<8x32xf32>
    %86 = vector.extract_strided_slice %83 {offsets = [0, 0], sizes = [8, 32], strides = [1, 1]} : vector<8x96xf32> to vector<8x32xf32>
    %87 = vector.extract_strided_slice %83 {offsets = [0, 32], sizes = [8, 32], strides = [1, 1]} : vector<8x96xf32> to vector<8x32xf32>
    %88 = vector.extract_strided_slice %83 {offsets = [0, 64], sizes = [8, 32], strides = [1, 1]} : vector<8x96xf32> to vector<8x32xf32>
    %89 = arith.mulf %87, %70 : vector<8x32xf32>
    %90 = arith.mulf %86, %85 : vector<8x32xf32>
    %91 = arith.addf %89, %90 : vector<8x32xf32>
    %92 = math.tanh %91 : vector<8x32xf32>
    %93 = arith.mulf %88, %92 : vector<8x32xf32>
    %c2_i32 = arith.constant 2 : i32
    %94 = arith.index_cast %c2_i32 : i32 to index
    %c0_37 = arith.constant 0 : index
    %c0_38 = arith.constant 0 : index
    %95 = vector.load %arg8[%94, %c0_37, %c0_38] : memref<8x8x128xf32, #tpu.memory_space<vmem>>, vector<1x8x128xf32>
    %96 = vector.shape_cast %95 : vector<1x8x128xf32> to vector<8x128xf32>
    %cst_39 = arith.constant dense<0.000000e+00> : vector<8x128xf32>
    %97 = tpu.matmul %93, %6, %cst_39 {dimension_numbers = #tpu.dot_dimension_numbers<[1], [0], [0], [1], [0, 0, 1, 1], [], []>, precision = #tpu.contract_precision<fp32>} : vector<8x32xf32>, vector<32x128xf32>, vector<8x128xf32> -> vector<8x128xf32>
    %98 = arith.addf %96, %97 : vector<8x128xf32>
    %99 = vector.extract_strided_slice %98 {offsets = [0, 0], sizes = [8, 96], strides = [1, 1]} : vector<8x128xf32> to vector<8x96xf32>
    %100 = arith.negf %99 : vector<8x96xf32>
    %101 = math.exp %100 : vector<8x96xf32>
    %cst_40 = arith.constant 1.000000e+00 : f32
    %102 = vector.broadcast %cst_40 : f32 to vector<8x96xf32>
    %103 = arith.addf %102, %101 : vector<8x96xf32>
    %104 = arith.divf %102, %103 : vector<8x96xf32>
    %105 = vector.extract_strided_slice %98 {offsets = [0, 96], sizes = [8, 32], strides = [1, 1]} : vector<8x128xf32> to vector<8x32xf32>
    %106 = math.tanh %105 : vector<8x32xf32>
    %107 = vector.extract_strided_slice %104 {offsets = [0, 0], sizes = [8, 32], strides = [1, 1]} : vector<8x96xf32> to vector<8x32xf32>
    %108 = vector.extract_strided_slice %104 {offsets = [0, 32], sizes = [8, 32], strides = [1, 1]} : vector<8x96xf32> to vector<8x32xf32>
    %109 = vector.extract_strided_slice %104 {offsets = [0, 64], sizes = [8, 32], strides = [1, 1]} : vector<8x96xf32> to vector<8x32xf32>
    %110 = arith.mulf %108, %91 : vector<8x32xf32>
    %111 = arith.mulf %107, %106 : vector<8x32xf32>
    %112 = arith.addf %110, %111 : vector<8x32xf32>
    %113 = math.tanh %112 : vector<8x32xf32>
    %114 = arith.mulf %109, %113 : vector<8x32xf32>
    %c3_i32 = arith.constant 3 : i32
    %115 = arith.index_cast %c3_i32 : i32 to index
    %c0_41 = arith.constant 0 : index
    %c0_42 = arith.constant 0 : index
    %116 = vector.load %arg8[%115, %c0_41, %c0_42] : memref<8x8x128xf32, #tpu.memory_space<vmem>>, vector<1x8x128xf32>
    %117 = vector.shape_cast %116 : vector<1x8x128xf32> to vector<8x128xf32>
    %cst_43 = arith.constant dense<0.000000e+00> : vector<8x128xf32>
    %118 = tpu.matmul %114, %6, %cst_43 {dimension_numbers = #tpu.dot_dimension_numbers<[1], [0], [0], [1], [0, 0, 1, 1], [], []>, precision = #tpu.contract_precision<fp32>} : vector<8x32xf32>, vector<32x128xf32>, vector<8x128xf32> -> vector<8x128xf32>
    %119 = arith.addf %117, %118 : vector<8x128xf32>
    %120 = vector.extract_strided_slice %119 {offsets = [0, 0], sizes = [8, 96], strides = [1, 1]} : vector<8x128xf32> to vector<8x96xf32>
    %121 = arith.negf %120 : vector<8x96xf32>
    %122 = math.exp %121 : vector<8x96xf32>
    %cst_44 = arith.constant 1.000000e+00 : f32
    %123 = vector.broadcast %cst_44 : f32 to vector<8x96xf32>
    %124 = arith.addf %123, %122 : vector<8x96xf32>
    %125 = arith.divf %123, %124 : vector<8x96xf32>
    %126 = vector.extract_strided_slice %119 {offsets = [0, 96], sizes = [8, 32], strides = [1, 1]} : vector<8x128xf32> to vector<8x32xf32>
    %127 = math.tanh %126 : vector<8x32xf32>
    %128 = vector.extract_strided_slice %125 {offsets = [0, 0], sizes = [8, 32], strides = [1, 1]} : vector<8x96xf32> to vector<8x32xf32>
    %129 = vector.extract_strided_slice %125 {offsets = [0, 32], sizes = [8, 32], strides = [1, 1]} : vector<8x96xf32> to vector<8x32xf32>
    %130 = vector.extract_strided_slice %125 {offsets = [0, 64], sizes = [8, 32], strides = [1, 1]} : vector<8x96xf32> to vector<8x32xf32>
    %131 = arith.mulf %129, %112 : vector<8x32xf32>
    %132 = arith.mulf %128, %127 : vector<8x32xf32>
    %133 = arith.addf %131, %132 : vector<8x32xf32>
    %134 = math.tanh %133 : vector<8x32xf32>
    %135 = arith.mulf %130, %134 : vector<8x32xf32>
    %c4_i32 = arith.constant 4 : i32
    %136 = arith.index_cast %c4_i32 : i32 to index
    %c0_45 = arith.constant 0 : index
    %c0_46 = arith.constant 0 : index
    %137 = vector.load %arg8[%136, %c0_45, %c0_46] : memref<8x8x128xf32, #tpu.memory_space<vmem>>, vector<1x8x128xf32>
    %138 = vector.shape_cast %137 : vector<1x8x128xf32> to vector<8x128xf32>
    %cst_47 = arith.constant dense<0.000000e+00> : vector<8x128xf32>
    %139 = tpu.matmul %135, %6, %cst_47 {dimension_numbers = #tpu.dot_dimension_numbers<[1], [0], [0], [1], [0, 0, 1, 1], [], []>, precision = #tpu.contract_precision<fp32>} : vector<8x32xf32>, vector<32x128xf32>, vector<8x128xf32> -> vector<8x128xf32>
    %140 = arith.addf %138, %139 : vector<8x128xf32>
    %141 = vector.extract_strided_slice %140 {offsets = [0, 0], sizes = [8, 96], strides = [1, 1]} : vector<8x128xf32> to vector<8x96xf32>
    %142 = arith.negf %141 : vector<8x96xf32>
    %143 = math.exp %142 : vector<8x96xf32>
    %cst_48 = arith.constant 1.000000e+00 : f32
    %144 = vector.broadcast %cst_48 : f32 to vector<8x96xf32>
    %145 = arith.addf %144, %143 : vector<8x96xf32>
    %146 = arith.divf %144, %145 : vector<8x96xf32>
    %147 = vector.extract_strided_slice %140 {offsets = [0, 96], sizes = [8, 32], strides = [1, 1]} : vector<8x128xf32> to vector<8x32xf32>
    %148 = math.tanh %147 : vector<8x32xf32>
    %149 = vector.extract_strided_slice %146 {offsets = [0, 0], sizes = [8, 32], strides = [1, 1]} : vector<8x96xf32> to vector<8x32xf32>
    %150 = vector.extract_strided_slice %146 {offsets = [0, 32], sizes = [8, 32], strides = [1, 1]} : vector<8x96xf32> to vector<8x32xf32>
    %151 = vector.extract_strided_slice %146 {offsets = [0, 64], sizes = [8, 32], strides = [1, 1]} : vector<8x96xf32> to vector<8x32xf32>
    %152 = arith.mulf %150, %133 : vector<8x32xf32>
    %153 = arith.mulf %149, %148 : vector<8x32xf32>
    %154 = arith.addf %152, %153 : vector<8x32xf32>
    %155 = math.tanh %154 : vector<8x32xf32>
    %156 = arith.mulf %151, %155 : vector<8x32xf32>
    %c5_i32 = arith.constant 5 : i32
    %157 = arith.index_cast %c5_i32 : i32 to index
    %c0_49 = arith.constant 0 : index
    %c0_50 = arith.constant 0 : index
    %158 = vector.load %arg8[%157, %c0_49, %c0_50] : memref<8x8x128xf32, #tpu.memory_space<vmem>>, vector<1x8x128xf32>
    %159 = vector.shape_cast %158 : vector<1x8x128xf32> to vector<8x128xf32>
    %cst_51 = arith.constant dense<0.000000e+00> : vector<8x128xf32>
    %160 = tpu.matmul %156, %6, %cst_51 {dimension_numbers = #tpu.dot_dimension_numbers<[1], [0], [0], [1], [0, 0, 1, 1], [], []>, precision = #tpu.contract_precision<fp32>} : vector<8x32xf32>, vector<32x128xf32>, vector<8x128xf32> -> vector<8x128xf32>
    %161 = arith.addf %159, %160 : vector<8x128xf32>
    %162 = vector.extract_strided_slice %161 {offsets = [0, 0], sizes = [8, 96], strides = [1, 1]} : vector<8x128xf32> to vector<8x96xf32>
    %163 = arith.negf %162 : vector<8x96xf32>
    %164 = math.exp %163 : vector<8x96xf32>
    %cst_52 = arith.constant 1.000000e+00 : f32
    %165 = vector.broadcast %cst_52 : f32 to vector<8x96xf32>
    %166 = arith.addf %165, %164 : vector<8x96xf32>
    %167 = arith.divf %165, %166 : vector<8x96xf32>
    %168 = vector.extract_strided_slice %161 {offsets = [0, 96], sizes = [8, 32], strides = [1, 1]} : vector<8x128xf32> to vector<8x32xf32>
    %169 = math.tanh %168 : vector<8x32xf32>
    %170 = vector.extract_strided_slice %167 {offsets = [0, 0], sizes = [8, 32], strides = [1, 1]} : vector<8x96xf32> to vector<8x32xf32>
    %171 = vector.extract_strided_slice %167 {offsets = [0, 32], sizes = [8, 32], strides = [1, 1]} : vector<8x96xf32> to vector<8x32xf32>
    %172 = vector.extract_strided_slice %167 {offsets = [0, 64], sizes = [8, 32], strides = [1, 1]} : vector<8x96xf32> to vector<8x32xf32>
    %173 = arith.mulf %171, %154 : vector<8x32xf32>
    %174 = arith.mulf %170, %169 : vector<8x32xf32>
    %175 = arith.addf %173, %174 : vector<8x32xf32>
    %176 = math.tanh %175 : vector<8x32xf32>
    %177 = arith.mulf %172, %176 : vector<8x32xf32>
    %c6_i32 = arith.constant 6 : i32
    %178 = arith.index_cast %c6_i32 : i32 to index
    %c0_53 = arith.constant 0 : index
    %c0_54 = arith.constant 0 : index
    %179 = vector.load %arg8[%178, %c0_53, %c0_54] : memref<8x8x128xf32, #tpu.memory_space<vmem>>, vector<1x8x128xf32>
    %180 = vector.shape_cast %179 : vector<1x8x128xf32> to vector<8x128xf32>
    %cst_55 = arith.constant dense<0.000000e+00> : vector<8x128xf32>
    %181 = tpu.matmul %177, %6, %cst_55 {dimension_numbers = #tpu.dot_dimension_numbers<[1], [0], [0], [1], [0, 0, 1, 1], [], []>, precision = #tpu.contract_precision<fp32>} : vector<8x32xf32>, vector<32x128xf32>, vector<8x128xf32> -> vector<8x128xf32>
    %182 = arith.addf %180, %181 : vector<8x128xf32>
    %183 = vector.extract_strided_slice %182 {offsets = [0, 0], sizes = [8, 96], strides = [1, 1]} : vector<8x128xf32> to vector<8x96xf32>
    %184 = arith.negf %183 : vector<8x96xf32>
    %185 = math.exp %184 : vector<8x96xf32>
    %cst_56 = arith.constant 1.000000e+00 : f32
    %186 = vector.broadcast %cst_56 : f32 to vector<8x96xf32>
    %187 = arith.addf %186, %185 : vector<8x96xf32>
    %188 = arith.divf %186, %187 : vector<8x96xf32>
    %189 = vector.extract_strided_slice %182 {offsets = [0, 96], sizes = [8, 32], strides = [1, 1]} : vector<8x128xf32> to vector<8x32xf32>
    %190 = math.tanh %189 : vector<8x32xf32>
    %191 = vector.extract_strided_slice %188 {offsets = [0, 0], sizes = [8, 32], strides = [1, 1]} : vector<8x96xf32> to vector<8x32xf32>
    %192 = vector.extract_strided_slice %188 {offsets = [0, 32], sizes = [8, 32], strides = [1, 1]} : vector<8x96xf32> to vector<8x32xf32>
    %193 = vector.extract_strided_slice %188 {offsets = [0, 64], sizes = [8, 32], strides = [1, 1]} : vector<8x96xf32> to vector<8x32xf32>
    %194 = arith.mulf %192, %175 : vector<8x32xf32>
    %195 = arith.mulf %191, %190 : vector<8x32xf32>
    %196 = arith.addf %194, %195 : vector<8x32xf32>
    %197 = math.tanh %196 : vector<8x32xf32>
    %198 = arith.mulf %193, %197 : vector<8x32xf32>
    %c7_i32 = arith.constant 7 : i32
    %199 = arith.index_cast %c7_i32 : i32 to index
    %c0_57 = arith.constant 0 : index
    %c0_58 = arith.constant 0 : index
    %200 = vector.load %arg8[%199, %c0_57, %c0_58] : memref<8x8x128xf32, #tpu.memory_space<vmem>>, vector<1x8x128xf32>
    %201 = vector.shape_cast %200 : vector<1x8x128xf32> to vector<8x128xf32>
    %cst_59 = arith.constant dense<0.000000e+00> : vector<8x128xf32>
    %202 = tpu.matmul %198, %6, %cst_59 {dimension_numbers = #tpu.dot_dimension_numbers<[1], [0], [0], [1], [0, 0, 1, 1], [], []>, precision = #tpu.contract_precision<fp32>} : vector<8x32xf32>, vector<32x128xf32>, vector<8x128xf32> -> vector<8x128xf32>
    %203 = arith.addf %201, %202 : vector<8x128xf32>
    %204 = vector.extract_strided_slice %203 {offsets = [0, 0], sizes = [8, 96], strides = [1, 1]} : vector<8x128xf32> to vector<8x96xf32>
    %205 = arith.negf %204 : vector<8x96xf32>
    %206 = math.exp %205 : vector<8x96xf32>
    %cst_60 = arith.constant 1.000000e+00 : f32
    %207 = vector.broadcast %cst_60 : f32 to vector<8x96xf32>
    %208 = arith.addf %207, %206 : vector<8x96xf32>
    %209 = arith.divf %207, %208 : vector<8x96xf32>
    %210 = vector.extract_strided_slice %203 {offsets = [0, 96], sizes = [8, 32], strides = [1, 1]} : vector<8x128xf32> to vector<8x32xf32>
    %211 = math.tanh %210 : vector<8x32xf32>
    %212 = vector.extract_strided_slice %209 {offsets = [0, 0], sizes = [8, 32], strides = [1, 1]} : vector<8x96xf32> to vector<8x32xf32>
    %213 = vector.extract_strided_slice %209 {offsets = [0, 32], sizes = [8, 32], strides = [1, 1]} : vector<8x96xf32> to vector<8x32xf32>
    %214 = vector.extract_strided_slice %209 {offsets = [0, 64], sizes = [8, 32], strides = [1, 1]} : vector<8x96xf32> to vector<8x32xf32>
    %215 = arith.mulf %213, %196 : vector<8x32xf32>
    %216 = arith.mulf %212, %211 : vector<8x32xf32>
    %217 = arith.addf %215, %216 : vector<8x32xf32>
    %218 = math.tanh %217 : vector<8x32xf32>
    %219 = arith.mulf %214, %218 : vector<8x32xf32>
    %c8_i32 = arith.constant 8 : i32
    %c0_61 = arith.constant 0 : index
    %c0_62 = arith.constant 0 : index
    %220 = vector.load %arg5[%c0_61, %c0_62] : memref<32x128xf32, #tpu.memory_space<vmem>>, vector<32x128xf32>
    %cst_63 = arith.constant dense<0.000000e+00> : vector<8x128xf32>
    %221 = tpu.matmul %219, %220, %cst_63 {dimension_numbers = #tpu.dot_dimension_numbers<[1], [0], [0], [1], [0, 0, 1, 1], [], []>, precision = #tpu.contract_precision<fp32>} : vector<8x32xf32>, vector<32x128xf32>, vector<8x128xf32> -> vector<8x128xf32>
    %222 = vector.broadcast %3 : vector<1x128xf32> to vector<8x128xf32>
    %223 = arith.addf %221, %222 : vector<8x128xf32>
    %224 = vector.extract_strided_slice %223 {offsets = [0, 0], sizes = [8, 1], strides = [1, 1]} : vector<8x128xf32> to vector<8x1xf32>
    %225 = vector.extract_strided_slice %223 {offsets = [0, 1], sizes = [8, 1], strides = [1, 1]} : vector<8x128xf32> to vector<8x1xf32>
    %226 = math.exp %225 : vector<8x1xf32>
    %c0_64 = arith.constant 0 : index
    %c0_65 = arith.constant 0 : index
    %227 = vector.load %arg2[%c0_64, %c0_65] : memref<8x1xf32, #tpu.memory_space<vmem>>, vector<8x1xf32>
    %228 = arith.mulf %226, %227 : vector<8x1xf32>
    %229 = arith.addf %224, %228 : vector<8x1xf32>
    %230 = math.tanh %229 : vector<8x1xf32>
    %cst_66 = arith.constant 1.000000e+00 : f32
    %231 = vector.broadcast %cst_66 : f32 to vector<8x1xf32>
    %232 = arith.addf %230, %231 : vector<8x1xf32>
    %cst_67 = arith.constant 5.000000e-01 : f32
    %233 = vector.broadcast %cst_67 : f32 to vector<8x1xf32>
    %234 = arith.mulf %233, %232 : vector<8x1xf32>
    %235 = vector.shape_cast %234 : vector<8x1xf32> to vector<8x1xf32>
    %236 = vector.broadcast %235 : vector<8x1xf32> to vector<8x128xf32>
    %c0_68 = arith.constant 0 : index
    %c0_69 = arith.constant 0 : index
    %237 = vector.load %arg7[%c0_68, %c0_69] : memref<8x128xf32, #tpu.memory_space<vmem>>, vector<8x128xf32>
    tpu.vector_store %arg7[%c0_68, %c0_69], %236 {strides = array<i32>} : memref<8x128xf32, #tpu.memory_space<vmem>>, vector<8x128xf32>,
    return
  }
  func.func @transform_0(%arg0: i32) -> (i32, i32, i32) {
    %c0_i32 = arith.constant 0 : i32
    %c0_i32_0 = arith.constant 0 : i32
    %c0_i32_1 = arith.constant 0 : i32
    return %arg0, %c0_i32, %c0_i32_0 : i32, i32, i32
  }
  func.func @transform_1(%arg0: i32) -> (i32, i32) {
    %c0_i32 = arith.constant 0 : i32
    %c0_i32_0 = arith.constant 0 : i32
    return %arg0, %c0_i32 : i32, i32
  }
  func.func @transform_2(%arg0: i32) -> (i32, i32) {
    %c0_i32 = arith.constant 0 : i32
    %c0_i32_0 = arith.constant 0 : i32
    %c0_i32_1 = arith.constant 0 : i32
    return %c0_i32, %c0_i32_0 : i32, i32
  }
  func.func @transform_3(%arg0: i32) -> (i32, i32) {
    %c0_i32 = arith.constant 0 : i32
    %c0_i32_0 = arith.constant 0 : i32
    %c0_i32_1 = arith.constant 0 : i32
    return %c0_i32, %c0_i32_0 : i32, i32
  }
  func.func @transform_4(%arg0: i32) -> (i32, i32) {
    %c0_i32 = arith.constant 0 : i32
    %c0_i32_0 = arith.constant 0 : i32
    %c0_i32_1 = arith.constant 0 : i32
    return %c0_i32, %c0_i32_0 : i32, i32
  }
  func.func @transform_5(%arg0: i32) -> (i32, i32) {
    %c0_i32 = arith.constant 0 : i32
    %c0_i32_0 = arith.constant 0 : i32
    %c0_i32_1 = arith.constant 0 : i32
    return %c0_i32, %c0_i32_0 : i32, i32
  }
  func.func @transform_6(%arg0: i32) -> (i32, i32) {
    %c0_i32 = arith.constant 0 : i32
    %c0_i32_0 = arith.constant 0 : i32
    return %arg0, %c0_i32 : i32, i32
  }
}

</mosaic_0001>

<bundles_post_ra>
// kernel: tpu_custom_call.1
= control target key start
LH: loop header
LB: loop body
LE: loop exit
PB: predicated region body
PF: predicated region fallthrough
CT: control target
= control target key end

     0   :  { %11 = vsyncpa [#allocation4], 0  ;;  %s3708_s0 = inlined_call_operand.vmem [shape: f32[1,64,24], index: 0, kind: input, shape index: {}]   ;;  %s3709_s1 = inlined_call_operand.vmem [shape: f32[8,1], index: 1, kind: input, shape index: {}]   ;;  %s3710_s2 = inlined_call_operand.hbm [shape: f32[24,32], index: 2, kind: input, shape index: {}]   ;;  %s3711_s3 = inlined_call_operand.vmem [shape: f32[64,128], index: 3, kind: input, shape index: {}]   ;;  %s3712_s4 = inlined_call_operand.vmem [shape: f32[32,128], index: 4, kind: input, shape index: {}]   ;;  %s3713_s5 = inlined_call_operand.vmem [shape: f32[3,128], index: 5, kind: input, shape index: {}]   ;;  %s3714_s6 = inlined_call_operand.hbm [shape: f32[8,128], index: 6, kind: output, shape index: {}]  }
   0x1   :  { %12 = vsyncpa [#allocation5], 0  ;;  %s21_s23 = sshll.u32 %s3710_s2, 4  ;;  %s3131_s24 = smov [#allocation3]   ;;  %s22_s23 = int_to_ptr.hbm [resolvable:$true] %s21_s23 }
   0x2   :  { %s23_s25 = sshll.u32 %s3131_s24, 4  ;;  %s3132_s26 = smov 128   ;;  %s24_s25 = int_to_ptr.vmem [resolvable:$true] %s23_s25 }
   0x3   :  { %s3133_s27 = smov 8  }
   0x4   :  { %29 = dma.hbm_to_vmem [thread:$0]  %s22_s23, 384, %s24_s25, [#allocation4], %s3132_s26, %s3132_s26, %s3133_s27  }
   0x5   :  { %3127 = dma.done.wait [#allocation4], 384  }
   0x6   :  { %3128 = vsyncadd [#allocation4], 4294966912  ;;  %vm61_vm0 = vcmask 195584   ;;  %v59_v0 = vld [vmem:[#allocation3 + $0x10] sm:$0xff]  ;;  %v58_v1 = vld [vmem:[#allocation3 + $0x8] sm:$0xff]  ;;  %vm484_vm1 = vcmask 261120  }
   0x7   :  { %v57_v2 = vld [vmem:[#allocation3] sm:$0xff]  ;;  %v99_v3 = vand.u32 4294901760, %v59_v0  ;;  %v101_v4 = vand.u32 4294901760, %v58_v1  ;;  %v50_v7 = vld [vmem:[%s3708_s0 + $0x8] sm:$0xff]  ;;  %v51_v8 = vld [vmem:[%s3708_s0 + $0x10] sm:$0xff]  ;;  %s3136_s11 = smov 64  }
   0x8   :  { %v103_v5 = vand.u32 4294901760, %v57_v2  ;;  %v49_v6 = vld [vmem:[%s3708_s0] sm:$0xff]  ;;  %v66_v10 = vsel %vm61_vm0, %v50_v7, 0  ;;  %v69_v16 = vsel %vm61_vm0, %v51_v8, 0  ;;  %v52_v33 = vld [vmem:[%s3708_s0 + $0x18] sm:$0xff]  ;;  %v54_v47 = vld [vmem:[%s3708_s0 + $0x28] sm:$0xff] }
   0x9   :  { %v63_v9 = vsel %vm61_vm0, %v49_v6, 0  ;;  %100 = vmatpush.msra.mxu0 %v99_v3  ;;  %v184_v11 = vsub.f32 %v59_v0, %v99_v3  ;;  %v190_v12 = vsub.f32 %v58_v1, %v101_v4  ;;  %311 = vmatpush.msra.mxu3 %v99_v3  ;;  %v3192_v15 = vand.u32 4294901760, %v66_v10  ;;  %v53_v40 = vld [vmem:[%s3708_s0 + $0x20] sm:$0xff]  ;;  %v55_v54 = vld [vmem:[%s3708_s0 + $0x30] sm:$0xff]  ;;  %v56_v61 = vld [vmem:[%s3708_s0 + $0x38] sm:$0xff]  ;;  %s3137_s20 = smov 1  }
   0xa   :  { %v196_v13 = vsub.f32 %v57_v2, %v103_v5  ;;  %v3190_v14 = vand.u32 4294901760, %v63_v9  ;;  %v3197_v26 = vand.u32 4294901760, %v69_v16  ;;  %v72_v36 = vsel %vm61_vm0, %v52_v33, 0  ;;  %s2980_s26 = sshll.u32 %s3714_s6, 4  ;;  %s2981_s26 = int_to_ptr.hbm [resolvable:$true] %s2980_s26 }
   0xb   :  { %249 = vmatpush.msra.mxu2 %v184_v11  ;;  %102 = vmatpush.msra.mxu0 %v101_v4  ;;  %v185_v17 = vand.u32 4294901760, %v184_v11  ;;  %v191_v19 = vand.u32 4294901760, %v190_v12  ;;  %v114_v21 = vsub.f32 %v66_v10, %v3192_v15  ;;  %v3205_v39 = vand.u32 4294901760, %v72_v36  ;;  %v44_v10 = vld [vmem:[%s3711_s3 + $0x18] sm:$0xff] }
   0xc   :  { %v106_v18 = vsub.f32 %v63_v9, %v3190_v14  ;;  %v197_v20 = vand.u32 4294901760, %v196_v13  ;;  %313 = vmatpush.msra.mxu3 %v101_v4  ;;  %v122_v35 = vsub.f32 %v69_v16, %v3197_v26  ;;  %v75_v43 = vsel %vm61_vm0, %v53_v40, 0 }
   0xd   :  { %252 = vmatpush.msra.mxu2 %v190_v12  ;;  %104 = vmatpush.msra.mxu0 %v103_v5  ;;  %v186_v22 = vsub.f32 %v184_v11, %v185_v17  ;;  %v192_v24 = vsub.f32 %v190_v12, %v191_v19  ;;  %v115_v30 = vand.u32 4294901760, %v114_v21  ;;  %v130_v42 = vsub.f32 %v72_v36, %v3205_v39 }
   0xe   :  { %v107_v23 = vand.u32 4294901760, %v106_v18  ;;  %v198_v25 = vsub.f32 %v196_v13, %v197_v20  ;;  %315 = vmatpush.msra.mxu3 %v103_v5  ;;  %v123_v38 = vand.u32 4294901760, %v122_v35  ;;  %v137_v46 = vand.u32 4294901760, %v75_v43 }
   0xf   :  { %381 = vmatpush.msrb.mxu0 %v185_v17  ;;  %v187_v27 = vand.u32 4294901760, %v186_v22  ;;  %255 = vmatpush.msra.mxu2 %v196_v13  ;;  %v193_v29 = vand.u32 4294901760, %v192_v24  ;;  %v116_v34 = vsub.f32 %v114_v21, %v115_v30  ;;  %v131_v45 = vand.u32 4294901760, %v130_v42 }
  0x10   :  { %v108_v28 = vsub.f32 %v106_v18, %v107_v23  ;;  %319 = vmatmul.f32.vlgmr.msra.gmra.mxu3 %v107_v23  ;;  %258 = vmatmul.f32.vlgmr.msra.gmra.mxu2 %v106_v18  ;;  %v199_v32 = vand.u32 4294901760, %v198_v25  ;;  %v124_v41 = vsub.f32 %v122_v35, %v123_v38  ;;  %v138_v49 = vsub.f32 %v75_v43, %v137_v46  ;;  %v43_v18 = vld [vmem:[%s3711_s3 + $0x10] sm:$0xff] }
  0x11   :  { %385 = vmatpush.msrb.mxu0 %v191_v19  ;;  %188 = vmatpush.msra.mxu1 %v187_v27  ;;  %v117_v37 = vand.u32 4294901760, %v116_v34  ;;  %v132_v48 = vsub.f32 %v130_v42, %v131_v45  ;;  %v78_v50 = vsel %vm61_vm0, %v54_v47, 0  ;;  %v81_v57 = vsel %vm61_vm0, %v55_v54, 0  ;;  %v3262_v47 = vld [vmem:[%s3713_s5] sm:$0x7] }
  0x12   :  { %v109_v31 = vand.u32 4294901760, %v108_v28  ;;  %v125_v44 = vand.u32 4294901760, %v124_v41  ;;  %v139_v52 = vand.u32 4294901760, %v138_v49  ;;  %v145_v53 = vand.u32 4294901760, %v78_v50  ;;  %v42_v28 = vld [vmem:[%s3711_s3 + $0x8] sm:$0xff] }
  0x13   :  { %389 = vmatpush.msrb.mxu0 %v197_v20  ;;  %194 = vmatpush.msra.mxu1 %v193_v29  ;;  %v133_v51 = vand.u32 4294901760, %v132_v48  ;;  %v153_v60 = vand.u32 4294901760, %v81_v57  ;;  %v84_v0 = vsel %vm61_vm0, %v56_v61, 0  ;;  %v521_v11 = vand.u32 4294901760, %v44_v10 }
  0x14   :  { %110 = vmatmul.f32.vlgmr.msra.gmra.mxu0 %v109_v31  ;;  %v140_v55 = vsub.f32 %v138_v49, %v139_v52  ;;  %v146_v56 = vsub.f32 %v78_v50, %v145_v53  ;;  %v523_v19 = vand.u32 4294901760, %v43_v18  ;;  %v525_v29 = vand.u32 4294901760, %v42_v28 }
  0x15   :  { %200 = vmatpush.msra.mxu1 %v199_v32  ;;  %v154_v63 = vsub.f32 %v81_v57, %v153_v60  ;;  %522 = vmatpush.msrb.mxu2 %v521_v11  ;;  %v607_v12 = vsub.f32 %v44_v10, %v521_v11 }
  0x16   :  { %202 = vmatmul.f32.vlgmr.msra.gmra.mxu1 %v3190_v14  ;;  %v141_v58 = vand.u32 4294901760, %v140_v55  ;;  %v147_v59 = vand.u32 4294901760, %v146_v56  ;;  %v613_v20 = vsub.f32 %v43_v18, %v523_v19 }
  0x17   :  { %437 = vmatpush.msrb.mxu1 %v99_v3  ;;  %v155_v2 = vand.u32 4294901760, %v154_v63  ;;  %v161_v3 = vand.u32 4294901760, %v84_v0  ;;  %v608_v13 = vand.u32 4294901760, %v607_v12  ;;  %677 = vmatpush.msra.mxu0 %v607_v12 }
  0x18   :  { %325 = vmatmul.f32.gmra.mxu3 %v115_v30  ;;  %263 = vmatmul.f32.gmra.mxu2 %v114_v21  ;;  %v148_v62 = vsub.f32 %v146_v56, %v147_v59  ;;  %v614_v22 = vand.u32 4294901760, %v613_v20  ;;  %v619_v30 = vsub.f32 %v42_v28, %v525_v29 }
  0x19   :  { %439 = vmatpush.msrb.mxu1 %v101_v4  ;;  %v156_v4 = vsub.f32 %v154_v63, %v155_v2  ;;  %524 = vmatpush.msrb.mxu2 %v523_v19 }
  0x1a   :  { %v149_v1 = vand.u32 4294901760, %v148_v62  ;;  %680 = vmatpush.msra.mxu0 %v613_v20  ;;  %v615_v24 = vsub.f32 %v613_v20, %v614_v22  ;;  %v620_v32 = vand.u32 4294901760, %v619_v30 }
  0x1b   :  { %441 = vmatpush.msrb.mxu1 %v103_v5  ;;  %v162_v5 = vsub.f32 %v84_v0, %v161_v3  ;;  %v157_v6 = vand.u32 4294901760, %v156_v4  ;;  %526 = vmatpush.msrb.mxu2 %v525_v29 }
  0x1c   :  { %118 = vmatmul.f32.gmra.mxu0 %v117_v37  ;;  %v616_v25 = vand.u32 4294901760, %v615_v24  ;;  %v621_v34 = vsub.f32 %v619_v30, %v620_v32  ;;  %v41_v37 = vld [vmem:[%s3711_s3] sm:$0xff] }
  0x1d   :  { %v163_v7 = vand.u32 4294901760, %v162_v5  ;;  %741 = vmatpush.msra.mxu1 %v521_v11  ;;  %683 = vmatpush.msra.mxu0 %v619_v30 }
  0x1e   :  { %206 = vmatmul.f32.gmra.mxu1 %v3192_v15 }
  0x1f   :  { %v164_v8 = vsub.f32 %v162_v5, %v163_v7  ;;  %743 = vmatpush.msra.mxu1 %v523_v19 }
  0x20   :  { %331 = vmatmul.f32.gmra.mxu3 %v123_v38  ;;  %268 = vmatmul.f32.gmra.mxu2 %v122_v35  ;;  %v622_v35 = vand.u32 4294901760, %v621_v34  ;;  %v527_v38 = vand.u32 4294901760, %v41_v37 }
  0x21   :  { %v165_v9 = vand.u32 4294901760, %v164_v8  ;;  %745 = vmatpush.msra.mxu1 %v525_v29 }
  0x22   :  { %528 = vmatpush.msrb.mxu2 %v527_v38  ;;  %v625_v40 = vsub.f32 %v41_v37, %v527_v38 }
  0x23   :  { %747 = vmatpush.msra.mxu1 %v527_v38 }
  0x24   :  { %126 = vmatmul.f32.gmra.mxu0 %v125_v44  ;;  %812 = vmatpush.msra.mxu2 %v608_v13  ;;  %v626_v41 = vand.u32 4294901760, %v625_v40 }
  0x25   :  { %686 = vmatpush.msra.mxu0 %v625_v40 }
  0x26   :  { %210 = vmatmul.f32.gmra.mxu1 %v3197_v26  ;;  %816 = vmatpush.msra.mxu2 %v614_v22 }
  0x28   :  { %337 = vmatmul.f32.gmra.mxu3 %v131_v45  ;;  %273 = vmatmul.f32.gmra.mxu2 %v130_v42  ;;  %v627_v42 = vsub.f32 %v625_v40, %v626_v41 }
  0x29   :  { %820 = vmatpush.msra.mxu2 %v620_v32 }
  0x2a   :  { %v628_v44 = vand.u32 4294901760, %v627_v42 }
  0x2b   :  { %824 = vmatpush.msra.mxu2 %v626_v41 }
  0x2c   :  { %134 = vmatmul.f32.gmra.mxu0 %v133_v51 }
  0x2e   :  { %214 = vmatmul.f32.gmra.mxu1 %v3205_v39 }
  0x30   :  { %343 = vmatmul.f32.gmra.mxu3 %v139_v52  ;;  %278 = vmatmul.f32.gmra.mxu2 %v138_v49  ;;  %v3265_v49 = vperm.slane %v3262_v47, 0 }
  0x34   :  { %142 = vmatmul.f32.gmra.mxu0 %v141_v58 }
  0x36   :  { %218 = vmatmul.f32.gmra.mxu1 %v137_v46 }
  0x38   :  { %349 = vmatmul.f32.gmra.mxu3 %v147_v59  ;;  %283 = vmatmul.f32.gmra.mxu2 %v146_v56 }
  0x3c   :  { %150 = vmatmul.f32.gmra.mxu0 %v149_v1 }
  0x3e   :  { %222 = vmatmul.f32.gmra.mxu1 %v145_v53 }
  0x40   :  { %355 = vmatmul.f32.gmra.mxu3 %v155_v2  ;;  %288 = vmatmul.f32.gmra.mxu2 %v154_v63 }
  0x44   :  { %158 = vmatmul.f32.gmra.mxu0 %v157_v6 }
  0x46   :  { %226 = vmatmul.f32.gmra.mxu1 %v153_v60 }
  0x48   :  { %361 = vmatmul.f32.gmra.mxu3 %v163_v7  ;;  %293 = vmatmul.f32.gmra.mxu2 %v162_v5 }
  0x4c   :  { %166 = vmatmul.f32.gmra.mxu0 %v165_v9 }
  0x4e   :  { %230 = vmatmul.f32.gmra.mxu1 %v161_v3 }
  0x54   :  { %391 = vmatmul.f32.vlgmr.msrb.gmra.mxu0 %v3190_v14 }
  0x56   :  { %443 = vmatmul.f32.vlgmr.msrb.gmra.mxu1 %v3190_v14  ;;  %v609_v14 = vsub.f32 %v607_v12, %v608_v13 }
  0x5c   :  { %395 = vmatmul.f32.gmra.mxu0 %v3192_v15 }
  0x5e   :  { %447 = vmatmul.f32.gmra.mxu1 %v3192_v15  ;;  %v610_v15 = vand.u32 4294901760, %v609_v14 }
  0x60   :  { %611 = vmatpush.msrb.mxu3 %v610_v15 }
  0x62   :  { %617 = vmatpush.msrb.mxu3 %v616_v25 }
  0x64   :  { %399 = vmatmul.f32.gmra.mxu0 %v3197_v26  ;;  %623 = vmatpush.msrb.mxu3 %v622_v35 }
  0x66   :  { %451 = vmatmul.f32.gmra.mxu1 %v3197_v26  ;;  %629 = vmatpush.msrb.mxu3 %v628_v44 }
  0x68   :  { %871 = vmatpush.msra.mxu3 %v521_v11 }
  0x6a   :  { %873 = vmatpush.msra.mxu3 %v523_v19 }
  0x6c   :  { %403 = vmatmul.f32.gmra.mxu0 %v3205_v39  ;;  %875 = vmatpush.msra.mxu3 %v525_v29 }
  0x6e   :  { %455 = vmatmul.f32.gmra.mxu1 %v3205_v39  ;;  %877 = vmatpush.msra.mxu3 %v527_v38 }
  0x74   :  { %407 = vmatmul.f32.gmra.mxu0 %v137_v46 }
  0x76   :  { %459 = vmatmul.f32.gmra.mxu1 %v137_v46 }
  0x7c   :  { %411 = vmatmul.f32.gmra.mxu0 %v145_v53 }
  0x7e   :  { %463 = vmatmul.f32.gmra.mxu1 %v145_v53 }
  0x84   :  { %415 = vmatmul.f32.gmra.mxu0 %v153_v60 }
  0x86   :  { %467 = vmatmul.f32.gmra.mxu1 %v153_v60 }
  0x8c   :  { %419 = vmatmul.f32.gmra.mxu0 %v161_v3 }
  0x8e   :  { %471 = vmatmul.f32.gmra.mxu1 %v161_v3 }
  0x91   :  { %v111_v16 = vpop.f32.mrf.mxu0 }
  0x92   :  { %v112_v52 = vadd.f32 %v111_v16, %v3265_v49 }
  0x93   :  { %v203_v17 = vpop.f32.mrf.mxu1  ;;  %v259_v45 = vpop.f32.mrf.mxu2 }
  0x94   :  { %v320_v48 = vpop.f32.mrf.mxu3  ;;  %v204_v54 = vadd.f32 %v203_v17, %v112_v52 }
  0x96   :  { %v260_v58 = vadd.f32 %v259_v45, %v204_v54 }
  0x98   :  { %v321_v61 = vadd.f32 %v320_v48, %v260_v58 }
  0x99   :  { %v119_v21 = vpop.f32.mrf.mxu0 }
  0x9a   :  { %v120_v59 = vadd.f32 %v119_v21, %v3265_v49 }
  0x9b   :  { %v207_v23 = vpop.f32.mrf.mxu1  ;;  %v264_v53 = vpop.f32.mrf.mxu2 }
  0x9c   :  { %v326_v56 = vpop.f32.mrf.mxu3  ;;  %v208_v62 = vadd.f32 %v207_v23, %v120_v59 }
  0x9e   :  { %v265_v3 = vadd.f32 %v264_v53, %v208_v62 }
  0xa0   :  { %v327_v7 = vadd.f32 %v326_v56, %v265_v3 }
  0xa1   :  { %v127_v26 = vpop.f32.mrf.mxu0 }
  0xa2   :  { %v128_v4 = vadd.f32 %v127_v26, %v3265_v49 }
  0xa3   :  { %v211_v27 = vpop.f32.mrf.mxu1  ;;  %v269_v60 = vpop.f32.mrf.mxu2 }
  0xa4   :  { %v332_v1 = vpop.f32.mrf.mxu3  ;;  %v212_v8 = vadd.f32 %v211_v27, %v128_v4 }
  0xa6   :  { %v270_v16 = vadd.f32 %v269_v60, %v212_v8 }
  0xa8   :  { %v333_v23 = vadd.f32 %v332_v1, %v270_v16 }
  0xa9   :  { %v3244_v31 = vpop.f32.mrf.mxu0 }
  0xaa   :  { %v136_v17 = vadd.f32 %v3244_v31, %v3265_v49 }
  0xab   :  { %v3246_v33 = vpop.f32.mrf.mxu1  ;;  %v274_v11 = vpop.f32.mrf.mxu2 }
  0xac   :  { %v338_v19 = vpop.f32.mrf.mxu3  ;;  %v216_v24 = vadd.f32 %v3246_v33, %v136_v17 }
  0xae   :  { %v275_v34 = vadd.f32 %v274_v11, %v216_v24 }
  0xb0   :  { %v339_v42 = vadd.f32 %v338_v19, %v275_v34 }
  0xb1   :  { %v3248_v36 = vpop.f32.mrf.mxu0 }
  0xb2   :  { %v144_v35 = vadd.f32 %v3248_v36, %v3265_v49 }
  0xb3   :  { %v3253_v39 = vpop.f32.mrf.mxu1  ;;  %v279_v30 = vpop.f32.mrf.mxu2 }
  0xb4   :  { %v344_v40 = vpop.f32.mrf.mxu3  ;;  %v220_v44 = vadd.f32 %v3253_v39, %v144_v35 }
  0xb6   :  { %v280_v58 = vadd.f32 %v279_v30, %v220_v44 }
  0xb9   :  { %v3255_v43 = vpop.f32.mrf.mxu0 }
  0xba   :  { %v152_v59 = vadd.f32 %v3255_v43, %v3265_v49 }
  0xbb   :  { %v3257_v46 = vpop.f32.mrf.mxu1 }
  0xbc   :  { %v224_v1 = vadd.f32 %v3257_v46, %v152_v59  ;;  %v350_v4 = vpop.f32.mrf.mxu3 }
  0xc1   :  { %v3267_v50 = vpop.f32.mrf.mxu0 }
  0xc3   :  { %v3269_v51 = vpop.f32.mrf.mxu1 }
  0xc9   :  { %v3272_v55 = vpop.f32.mrf.mxu0 }
  0xcb   :  { %v3274_v57 = vpop.f32.mrf.mxu1 }
  0xd1   :  { %v392_v63 = vpop.f32.mrf.mxu0 }
  0xd2   :  { %v393_v0 = vadd.f32 %v392_v63, %v321_v61  ;;  %v284_v61 = vpop.f32.mrf.mxu2 }
  0xd3   :  { %v444_v2 = vpop.f32.mrf.mxu1 }
  0xd4   :  { %v445_v5 = vadd.f32 %v444_v2, %v393_v0  ;;  %v345_v0 = vadd.f32 %v344_v40, %v280_v58 }
  0xd6   :  { %v475_v6 = vmax.f32 %v445_v5, 0.0 }
  0xd8   :  { %v486_v9 = vsel %vm484_vm1, %v475_v6, 0 }
  0xd9   :  { %v396_v10 = vpop.f32.mrf.mxu0  ;;  %v3279_v12 = vand.u32 4294901760, %v486_v9 }
  0xda   :  { %v397_v13 = vadd.f32 %v396_v10, %v327_v7  ;;  %v160_v10 = vadd.f32 %v3267_v50, %v3265_v49 }
  0xdb   :  { %v530_v14 = vsub.f32 %v486_v9, %v3279_v12  ;;  %v448_v15 = vpop.f32.mrf.mxu1  ;;  %631 = vmatmul.f32.vlgmr.msrb.gmra.mxu3 %v3279_v12  ;;  %v285_v9 = vadd.f32 %v284_v61, %v224_v1 }
  0xdc   :  { %v449_v18 = vadd.f32 %v448_v15, %v397_v13  ;;  %v228_v17 = vadd.f32 %v3269_v51, %v160_v10 }
  0xdd   :  { %689 = vmatmul.f32.vlgmr.msra.gmra.mxu0 %v530_v14  ;;  %v531_v20 = vand.u32 4294901760, %v530_v14  ;;  %v351_v16 = vadd.f32 %v350_v4, %v285_v9 }
  0xde   :  { %v476_v21 = vmax.f32 %v449_v18, 0.0 }
  0xdf   :  { %751 = vmatmul.f32.vlgmr.msra.gmra.mxu1 %v531_v20  ;;  %v532_v22 = vsub.f32 %v530_v14, %v531_v20  ;;  %v289_v14 = vpop.f32.mrf.mxu2 }
  0xe0   :  { %v489_v25 = vsel %vm484_vm1, %v476_v21, 0 }
  0xe1   :  { %v400_v26 = vpop.f32.mrf.mxu0  ;;  %v3287_v27 = vand.u32 4294901760, %v489_v25  ;;  %v533_v28 = vand.u32 4294901760, %v532_v22 }
  0xe2   :  { %v401_v29 = vadd.f32 %v400_v26, %v333_v23  ;;  %v356_v23 = vpop.f32.mrf.mxu3  ;;  %v168_v26 = vadd.f32 %v3272_v55, %v3265_v49  ;;  %v48_v55 = vld [vmem:[%s3711_s3 + $0x38] sm:$0xff] }
  0xe3   :  { %v452_v32 = vpop.f32.mrf.mxu1  ;;  %534 = vmatmul.f32.vlgmr.msrb.gmra.mxu2 %v533_v28  ;;  %635 = vmatmul.f32.gmra.mxu3 %v3287_v27  ;;  %v538_v31 = vsub.f32 %v489_v25, %v3287_v27  ;;  %v290_v25 = vadd.f32 %v289_v14, %v228_v17  ;;  %v3326_v44 = vand.u32 4294901760, %v48_v55 }
  0xe4   :  { %v453_v37 = vadd.f32 %v452_v32, %v401_v29 }
  0xe5   :  { %694 = vmatmul.f32.gmra.mxu0 %v538_v31  ;;  %v539_v33 = vand.u32 4294901760, %v538_v31  ;;  %v357_v32 = vadd.f32 %v356_v23, %v290_v25  ;;  %1043 = vmatpush.msrb.mxu3 %v3326_v44  ;;  %v45_v25 = vld [vmem:[%s3711_s3 + $0x20] sm:$0xff] }
  0xe6   :  { %v477_v38 = vmax.f32 %v453_v37, 0.0  ;;  %943 = vmatpush.msrb.mxu0 %v3326_v44 }
  0xe7   :  { %757 = vmatmul.f32.gmra.mxu1 %v539_v33  ;;  %v540_v41 = vsub.f32 %v538_v31, %v539_v33  ;;  %v232_v31 = vadd.f32 %v3274_v57, %v168_v26  ;;  %v294_v37 = vpop.f32.mrf.mxu2  ;;  %v3400_v26 = vand.u32 4294901760, %v45_v25 }
  0xe8   :  { %v492_v45 = vsel %vm484_vm1, %v477_v38, 0 }
  0xe9   :  { %v404_v48 = vpop.f32.mrf.mxu0  ;;  %v3295_v52 = vand.u32 4294901760, %v492_v45  ;;  %v541_v53 = vand.u32 4294901760, %v540_v41 }
  0xea   :  { %v405_v54 = vadd.f32 %v404_v48, %v339_v42  ;;  %v295_v42 = vadd.f32 %v294_v37, %v232_v31 }
  0xeb   :  { %v456_v56 = vpop.f32.mrf.mxu1  ;;  %542 = vmatmul.f32.gmra.mxu2 %v541_v53  ;;  %639 = vmatmul.f32.gmra.mxu3 %v3295_v52  ;;  %v546_v36 = vsub.f32 %v492_v45, %v3295_v52  ;;  %v362_v45 = vpop.f32.mrf.mxu3 }
  0xec   :  { %v457_v60 = vadd.f32 %v456_v56, %v405_v54  ;;  %v3329_v54 = vsub.f32 %v48_v55, %v3326_v44 }
  0xed   :  { %699 = vmatmul.f32.gmra.mxu0 %v546_v36  ;;  %v547_v39 = vand.u32 4294901760, %v546_v36 }
  0xee   :  { %v478_v62 = vmax.f32 %v457_v60, 0.0  ;;  %1014 = vmatpush.msrb.mxu2 %v3329_v54  ;;  %v3336_v60 = vand.u32 4294901760, %v3329_v54 }
  0xef   :  { %763 = vmatmul.f32.gmra.mxu1 %v547_v39  ;;  %v548_v63 = vsub.f32 %v546_v36, %v547_v39  ;;  %v363_v36 = vadd.f32 %v362_v45, %v295_v42 }
  0xf0   :  { %v495_v2 = vsel %vm484_vm1, %v478_v62, 0 }
  0xf1   :  { %v408_v3 = vpop.f32.mrf.mxu0  ;;  %v3303_v5 = vand.u32 4294901760, %v495_v2  ;;  %v549_v6 = vand.u32 4294901760, %v548_v63  ;;  %v974_v63 = vsub.f32 %v3329_v54, %v3336_v60 }
  0xf2   :  { %v409_v7 = vadd.f32 %v408_v3, %v345_v0 }
  0xf3   :  { %v460_v8 = vpop.f32.mrf.mxu1  ;;  %550 = vmatmul.f32.gmra.mxu2 %v549_v6  ;;  %643 = vmatmul.f32.gmra.mxu3 %v3303_v5  ;;  %v554_v43 = vsub.f32 %v495_v2, %v3303_v5  ;;  %v3344_v3 = vand.u32 4294901760, %v974_v63 }
  0xf4   :  { %v461_v11 = vadd.f32 %v460_v8, %v409_v7 }
  0xf5   :  { %704 = vmatmul.f32.gmra.mxu0 %v554_v43  ;;  %v555_v46 = vand.u32 4294901760, %v554_v43  ;;  %976 = vmatpush.msrb.mxu1 %v3344_v3 }
  0xf6   :  { %v479_v13 = vmax.f32 %v461_v11, 0.0  ;;  %v47_v11 = vld [vmem:[%s3711_s3 + $0x30] sm:$0xff] }
  0xf7   :  { %769 = vmatmul.f32.gmra.mxu1 %v555_v46  ;;  %v556_v15 = vsub.f32 %v554_v43, %v555_v46  ;;  %v3355_v46 = vand.u32 4294901760, %v47_v11 }
  0xf8   :  { %v498_v18 = vsel %vm484_vm1, %v479_v13, 0 }
  0xf9   :  { %v412_v19 = vpop.f32.mrf.mxu0  ;;  %v3311_v20 = vand.u32 4294901760, %v498_v18  ;;  %v557_v21 = vand.u32 4294901760, %v556_v15  ;;  %v3358_v14 = vsub.f32 %v47_v11, %v3355_v46  ;;  %945 = vmatpush.msrb.mxu0 %v3355_v46  ;;  %1045 = vmatpush.msrb.mxu3 %v3355_v46 }
  0xfa   :  { %v413_v22 = vadd.f32 %v412_v19, %v351_v16 }
  0xfb   :  { %v464_v24 = vpop.f32.mrf.mxu1  ;;  %558 = vmatmul.f32.gmra.mxu2 %v557_v21  ;;  %647 = vmatmul.f32.gmra.mxu3 %v3311_v20  ;;  %v562_v50 = vsub.f32 %v498_v18, %v3311_v20  ;;  %v3364_v16 = vand.u32 4294901760, %v3358_v14  ;;  %v46_v21 = vld [vmem:[%s3711_s3 + $0x28] sm:$0xff]  ;;  %s3135_s3 = smov 32  }
  0xfc   :  { %v465_v28 = vadd.f32 %v464_v24, %v413_v22  ;;  %1017 = vmatpush.msrb.mxu2 %v3358_v14  ;;  %v3377_v22 = vand.u32 4294901760, %v46_v21 }
  0xfd   :  { %709 = vmatmul.f32.gmra.mxu0 %v562_v50  ;;  %v563_v51 = vand.u32 4294901760, %v562_v50  ;;  %v980_v18 = vsub.f32 %v3358_v14, %v3364_v16 }
  0xfe   :  { %v480_v29 = vmax.f32 %v465_v28, 0.0  ;;  %v3380_v23 = vsub.f32 %v46_v21, %v3377_v22  ;;  %947 = vmatpush.msrb.mxu0 %v3377_v22  ;;  %1047 = vmatpush.msrb.mxu3 %v3377_v22  ;;  %v3403_v28 = vsub.f32 %v45_v25, %v3400_v26 }
  0xff   :  { %775 = vmatmul.f32.gmra.mxu1 %v563_v51  ;;  %v564_v30 = vsub.f32 %v562_v50, %v563_v51  ;;  %v3369_v19 = vand.u32 4294901760, %v980_v18 }
 0x100   :  { %v501_v34 = vsel %vm484_vm1, %v480_v29, 0  ;;  %1020 = vmatpush.msrb.mxu2 %v3380_v23  ;;  %v3386_v24 = vand.u32 4294901760, %v3380_v23  ;;  %949 = vmatpush.msrb.mxu0 %v3400_v26 }
 0x101   :  { %v416_v35 = vpop.f32.mrf.mxu0  ;;  %v3319_v33 = vand.u32 4294901760, %v501_v34  ;;  %v565_v38 = vand.u32 4294901760, %v564_v30  ;;  %982 = vmatpush.msrb.mxu1 %v3369_v19  ;;  %1049 = vmatpush.msrb.mxu3 %v3400_v26 }
 0x102   :  { %v417_v40 = vadd.f32 %v416_v35, %v357_v32  ;;  %1072 = vmatpush.msra.mxu0 %v3336_v60  ;;  %1023 = vmatpush.msrb.mxu2 %v3403_v28  ;;  %v483_v32 = vperm.slane %v3262_v47, 1 }
 0x103   :  { %v468_v41 = vpop.f32.mrf.mxu1  ;;  %566 = vmatmul.f32.gmra.mxu2 %v565_v38  ;;  %651 = vmatmul.f32.gmra.mxu3 %v3319_v33  ;;  %v570_v49 = vsub.f32 %v501_v34, %v3319_v33 }
 0x104   :  { %v469_v57 = vadd.f32 %v468_v41, %v417_v40  ;;  %1076 = vmatpush.msra.mxu0 %v3364_v16 }
 0x105   :  { %714 = vmatmul.f32.gmra.mxu0 %v570_v49  ;;  %v571_v48 = vand.u32 4294901760, %v570_v49 }
 0x106   :  { %v481_v53 = vmax.f32 %v469_v57, 0.0  ;;  %1080 = vmatpush.msra.mxu0 %v3386_v24 }
 0x107   :  { %781 = vmatmul.f32.gmra.mxu1 %v571_v48  ;;  %v572_v56 = vsub.f32 %v570_v49, %v571_v48 }
 0x108   :  { %v504_v58 = vsel %vm484_vm1, %v481_v53, 0 }
 0x109   :  { %v420_v59 = vpop.f32.mrf.mxu0  ;;  %v3338_v61 = vand.u32 4294901760, %v504_v58  ;;  %v573_v39 = vand.u32 4294901760, %v572_v56 }
 0x10a   :  { %v421_v62 = vadd.f32 %v420_v59, %v363_v36 }
 0x10b   :  { %v472_v0 = vpop.f32.mrf.mxu1  ;;  %574 = vmatmul.f32.gmra.mxu2 %v573_v39  ;;  %655 = vmatmul.f32.gmra.mxu3 %v3338_v61  ;;  %v578_v1 = vsub.f32 %v504_v58, %v3338_v61 }
 0x10c   :  { %v473_v2 = vadd.f32 %v472_v0, %v421_v62 }
 0x10d   :  { %719 = vmatmul.f32.gmra.mxu0 %v578_v1  ;;  %v579_v4 = vand.u32 4294901760, %v578_v1 }
 0x10e   :  { %v482_v6 = vmax.f32 %v473_v2, 0.0 }
 0x10f   :  { %787 = vmatmul.f32.gmra.mxu1 %v579_v4  ;;  %v580_v7 = vsub.f32 %v578_v1, %v579_v4 }
 0x110   :  { %v507_v8 = vsel %vm484_vm1, %v482_v6, 0 }
 0x111   :  { %v3348_v43 = vand.u32 4294901760, %v507_v8  ;;  %v581_v9 = vand.u32 4294901760, %v580_v7 }
 0x113   :  { %582 = vmatmul.f32.gmra.mxu2 %v581_v9  ;;  %659 = vmatmul.f32.gmra.mxu3 %v3348_v43  ;;  %v586_v10 = vsub.f32 %v507_v8, %v3348_v43 }
 0x115   :  { %724 = vmatmul.f32.gmra.mxu0 %v586_v10  ;;  %v587_v13 = vand.u32 4294901760, %v586_v10 }
 0x117   :  { %793 = vmatmul.f32.gmra.mxu1 %v587_v13  ;;  %v588_v15 = vsub.f32 %v586_v10, %v587_v13 }
 0x119   :  { %v589_v17 = vand.u32 4294901760, %v588_v15 }
 0x11b   :  { %590 = vmatmul.f32.gmra.mxu2 %v589_v17  ;;  %879 = vmatmul.f32.vlgmr.msra.gmra.mxu3 %v3279_v12 }
 0x11c   :  { %1205 = vmatpush.msra.mxu3 %v3344_v3 }
 0x11e   :  { %1211 = vmatpush.msra.mxu3 %v3369_v19 }
 0x123   :  { %826 = vmatmul.f32.vlgmr.msra.gmra.mxu2 %v3279_v12  ;;  %883 = vmatmul.f32.gmra.mxu3 %v3287_v27  ;;  %v986_v12 = vsub.f32 %v3380_v23, %v3386_v24 }
 0x124   :  { %1172 = vmatpush.msra.mxu2 %v3326_v44 }
 0x125   :  { %v3392_v50 = vand.u32 4294901760, %v986_v12 }
 0x126   :  { %1174 = vmatpush.msra.mxu2 %v3355_v46 }
 0x127   :  { %988 = vmatpush.msrb.mxu1 %v3392_v50  ;;  %1217 = vmatpush.msra.mxu3 %v3392_v50 }
 0x128   :  { %1176 = vmatpush.msra.mxu2 %v3377_v22 }
 0x12a   :  { %1178 = vmatpush.msra.mxu2 %v3400_v26 }
 0x12b   :  { %830 = vmatmul.f32.gmra.mxu2 %v3287_v27  ;;  %887 = vmatmul.f32.gmra.mxu3 %v3295_v52  ;;  %v3411_v27 = vand.u32 4294901760, %v3403_v28 }
 0x12d   :  { %1084 = vmatpush.msra.mxu0 %v3411_v27 }
 0x133   :  { %834 = vmatmul.f32.gmra.mxu2 %v3295_v52  ;;  %891 = vmatmul.f32.gmra.mxu3 %v3303_v5  ;;  %v992_v52 = vsub.f32 %v3403_v28, %v3411_v27 }
 0x135   :  { %v3420_v51 = vand.u32 4294901760, %v992_v52 }
 0x137   :  { %994 = vmatpush.msrb.mxu1 %v3420_v51  ;;  %1223 = vmatpush.msra.mxu3 %v3420_v51 }
 0x139   :  { %1103 = vmatpush.msra.mxu1 %v3326_v44 }
 0x13b   :  { %838 = vmatmul.f32.gmra.mxu2 %v3303_v5  ;;  %895 = vmatmul.f32.gmra.mxu3 %v3311_v20  ;;  %v3134_v5 = vmov 0.0  }
 0x13c   :  { %1105 = vmatpush.msra.mxu1 %v3355_v46  ;;  %955 = vmatmul.f32.vlgmr.msrb.gmra.mxu0 %v3134_v5 }
 0x13d   :  { %996 = vmatmul.f32.vlgmr.msrb.gmra.mxu1 %v3134_v5  ;;  %1243 = vmatpush.msrb.mxu0 %v3329_v54 }
 0x13e   :  { %1107 = vmatpush.msra.mxu1 %v3377_v22 }
 0x13f   :  { %1246 = vmatpush.msrb.mxu0 %v3358_v14 }
 0x140   :  { %1109 = vmatpush.msra.mxu1 %v3400_v26 }
 0x141   :  { %1249 = vmatpush.msrb.mxu0 %v3380_v23 }
 0x142   :  { %1272 = vmatpush.msrb.mxu1 %v3326_v44 }
 0x143   :  { %842 = vmatmul.f32.gmra.mxu2 %v3311_v20  ;;  %899 = vmatmul.f32.gmra.mxu3 %v3319_v33 }
 0x144   :  { %1274 = vmatpush.msrb.mxu1 %v3355_v46  ;;  %1086 = vmatmul.f32.vlgmr.msra.gmra.mxu0 %v3134_v5 }
 0x145   :  { %1111 = vmatmul.f32.vlgmr.msra.gmra.mxu1 %v3134_v5  ;;  %1252 = vmatpush.msrb.mxu0 %v3403_v28 }
 0x146   :  { %1276 = vmatpush.msrb.mxu1 %v3377_v22 }
 0x147   :  { %1401 = vmatpush.msra.mxu0 %v3326_v44 }
 0x148   :  { %1278 = vmatpush.msrb.mxu1 %v3400_v26 }
 0x149   :  { %1403 = vmatpush.msra.mxu0 %v3355_v46 }
 0x14a   :  { %1434 = vmatpush.msra.mxu1 %v3344_v3 }
 0x14b   :  { %846 = vmatmul.f32.gmra.mxu2 %v3319_v33  ;;  %903 = vmatmul.f32.gmra.mxu3 %v3338_v61 }
 0x14c   :  { %1440 = vmatpush.msra.mxu1 %v3369_v19  ;;  %1405 = vmatpush.msra.mxu0 %v3377_v22 }
 0x14e   :  { %1446 = vmatpush.msra.mxu1 %v3392_v50  ;;  %1407 = vmatpush.msra.mxu0 %v3400_v26 }
 0x150   :  { %1452 = vmatpush.msra.mxu1 %v3420_v51 }
 0x153   :  { %850 = vmatmul.f32.gmra.mxu2 %v3338_v61  ;;  %907 = vmatmul.f32.gmra.mxu3 %v3348_v43 }
 0x15a   :  { %v690_v20 = vpop.f32.mrf.mxu0 }
 0x15b   :  { %854 = vmatmul.f32.gmra.mxu2 %v3348_v43  ;;  %1053 = vmatmul.f32.vlgmr.msrb.gmra.mxu3 %v3134_v5 }
 0x15c   :  { %1332 = vmatpush.msrb.mxu3 %v3326_v44  ;;  %v752_v29 = vpop.f32.mrf.mxu1 }
 0x15e   :  { %v632_v30 = vpop.f32.mrf.mxu3  ;;  %1334 = vmatpush.msrb.mxu3 %v3355_v46 }
 0x160   :  { %1336 = vmatpush.msrb.mxu3 %v3377_v22 }
 0x162   :  { %1338 = vmatpush.msrb.mxu3 %v3400_v26  ;;  %v695_v31 = vpop.f32.mrf.mxu0 }
 0x163   :  { %1026 = vmatmul.f32.vlgmr.msrb.gmra.mxu2 %v3134_v5 }
 0x164   :  { %1301 = vmatpush.msrb.mxu2 %v3336_v60  ;;  %v758_v37 = vpop.f32.mrf.mxu1 }
 0x166   :  { %v535_v34 = vpop.f32.mrf.mxu2  ;;  %v636_v35 = vpop.f32.mrf.mxu3  ;;  %1305 = vmatpush.msrb.mxu2 %v3364_v16 }
 0x167   :  { %v536_v33 = vadd.f32 %v535_v34, %v483_v32 }
 0x168   :  { %1309 = vmatpush.msrb.mxu2 %v3386_v24 }
 0x169   :  { %v633_v38 = vadd.f32 %v632_v30, %v536_v33 }
 0x16a   :  { %1313 = vmatpush.msrb.mxu2 %v3411_v27  ;;  %v700_v42 = vpop.f32.mrf.mxu0 }
 0x16b   :  { %v691_v40 = vadd.f32 %v690_v20, %v633_v38 }
 0x16c   :  { %v764_v57 = vpop.f32.mrf.mxu1 }
 0x16d   :  { %v753_v41 = vadd.f32 %v752_v29, %v691_v40 }
 0x16e   :  { %v543_v49 = vpop.f32.mrf.mxu2  ;;  %v640_v55 = vpop.f32.mrf.mxu3 }
 0x16f   :  { %v544_v47 = vadd.f32 %v543_v49, %v483_v32 }
 0x171   :  { %v637_v45 = vadd.f32 %v636_v35, %v544_v47 }
 0x172   :  { %v705_v59 = vpop.f32.mrf.mxu0 }
 0x173   :  { %v696_v48 = vadd.f32 %v695_v31, %v637_v45 }
 0x174   :  { %v770_v39 = vpop.f32.mrf.mxu1 }
 0x175   :  { %v759_v53 = vadd.f32 %v758_v37, %v696_v48 }
 0x176   :  { %v551_v56 = vpop.f32.mrf.mxu2  ;;  %v644_v36 = vpop.f32.mrf.mxu3 }
 0x177   :  { %v552_v58 = vadd.f32 %v551_v56, %v483_v32 }
 0x179   :  { %v641_v61 = vadd.f32 %v640_v55, %v552_v58 }
 0x17a   :  { %v710_v6 = vpop.f32.mrf.mxu0 }
 0x17b   :  { %v701_v62 = vadd.f32 %v700_v42, %v641_v61 }
 0x17c   :  { %v776_v8 = vpop.f32.mrf.mxu1 }
 0x17d   :  { %v765_v63 = vadd.f32 %v764_v57, %v701_v62 }
 0x17e   :  { %v559_v0 = vpop.f32.mrf.mxu2  ;;  %v648_v1 = vpop.f32.mrf.mxu3 }
 0x17f   :  { %v560_v2 = vadd.f32 %v559_v0, %v483_v32 }
 0x181   :  { %v645_v4 = vadd.f32 %v644_v36, %v560_v2 }
 0x182   :  { %v715_v17 = vpop.f32.mrf.mxu0 }
 0x183   :  { %v706_v7 = vadd.f32 %v705_v59, %v645_v4 }
 0x184   :  { %v782_v52 = vpop.f32.mrf.mxu1 }
 0x185   :  { %v771_v43 = vadd.f32 %v770_v39, %v706_v7 }
 0x186   :  { %v567_v9 = vpop.f32.mrf.mxu2  ;;  %v652_v10 = vpop.f32.mrf.mxu3 }
 0x187   :  { %v568_v11 = vadd.f32 %v567_v9, %v483_v32 }
 0x189   :  { %v649_v13 = vadd.f32 %v648_v1, %v568_v11 }
 0x18a   :  { %v720_v35 = vpop.f32.mrf.mxu0 }
 0x18b   :  { %v711_v15 = vadd.f32 %v710_v6, %v649_v13 }
 0x18c   :  { %v788_v33 = vpop.f32.mrf.mxu1 }
 0x18d   :  { %v777_v18 = vadd.f32 %v776_v8, %v711_v15 }
 0x18e   :  { %v575_v21 = vpop.f32.mrf.mxu2  ;;  %v656_v12 = vpop.f32.mrf.mxu3 }
 0x18f   :  { %v576_v25 = vadd.f32 %v575_v21, %v483_v32 }
 0x191   :  { %v653_v5 = vadd.f32 %v652_v10, %v576_v25 }
 0x192   :  { %v725_v57 = vpop.f32.mrf.mxu0 }
 0x193   :  { %v716_v20 = vadd.f32 %v715_v17, %v653_v5 }
 0x194   :  { %v794_v48 = vpop.f32.mrf.mxu1 }
 0x195   :  { %v783_v29 = vadd.f32 %v782_v52, %v716_v20 }
 0x196   :  { %v583_v30 = vpop.f32.mrf.mxu2  ;;  %v660_v31 = vpop.f32.mrf.mxu3 }
 0x197   :  { %v584_v34 = vadd.f32 %v583_v30, %v483_v32 }
 0x199   :  { %v657_v37 = vadd.f32 %v656_v12, %v584_v34 }
 0x19b   :  { %v721_v38 = vadd.f32 %v720_v35, %v657_v37 }
 0x19d   :  { %v789_v40 = vadd.f32 %v788_v33, %v721_v38 }
 0x19e   :  { %v591_v49 = vpop.f32.mrf.mxu2  ;;  %v880_v55 = vpop.f32.mrf.mxu3 }
 0x19f   :  { %v592_v42 = vadd.f32 %v591_v49, %v483_v32 }
 0x1a1   :  { %v661_v47 = vadd.f32 %v660_v31, %v592_v42 }
 0x1a3   :  { %v726_v45 = vadd.f32 %v725_v57, %v661_v47 }
 0x1a5   :  { %v795_v56 = vadd.f32 %v794_v48, %v726_v45 }
 0x1a6   :  { %v827_v36 = vpop.f32.mrf.mxu2  ;;  %v884_v58 = vpop.f32.mrf.mxu3 }
 0x1a7   :  { %v828_v59 = vadd.f32 %v827_v36, %v753_v41 }
 0x1a9   :  { %v881_v61 = vadd.f32 %v880_v55, %v828_v59 }
 0x1ae   :  { %v831_v39 = vpop.f32.mrf.mxu2  ;;  %v888_v62 = vpop.f32.mrf.mxu3 }
 0x1af   :  { %v832_v0 = vadd.f32 %v831_v39, %v759_v53 }
 0x1b1   :  { %v3466_v1 = vadd.f32 %v884_v58, %v832_v0 }
 0x1b6   :  { %v835_v2 = vpop.f32.mrf.mxu2  ;;  %v892_v4 = vpop.f32.mrf.mxu3 }
 0x1b7   :  { %v836_v6 = vadd.f32 %v835_v2, %v765_v63 }
 0x1b9   :  { %v3468_v7 = vadd.f32 %v888_v62, %v836_v6  ;;  %v956_v5 = vpop.f32.mrf.mxu0 }
 0x1ba   :  { %v997_v34 = vpop.f32.mrf.mxu1 }
 0x1be   :  { %v839_v32 = vpop.f32.mrf.mxu2  ;;  %v896_v9 = vpop.f32.mrf.mxu3 }
 0x1bf   :  { %v840_v8 = vadd.f32 %v839_v32, %v771_v43 }
 0x1c1   :  { %v3470_v10 = vadd.f32 %v892_v4, %v840_v8  ;;  %v1087_v38 = vpop.f32.mrf.mxu0 }
 0x1c2   :  { %v1112_v49 = vpop.f32.mrf.mxu1 }
 0x1c6   :  { %v843_v11 = vpop.f32.mrf.mxu2  ;;  %v900_v41 = vpop.f32.mrf.mxu3 }
 0x1c7   :  { %v844_v13 = vadd.f32 %v843_v11, %v777_v18  ;;  %v998_v18 = vadd.f32 %v997_v34, %v956_v5 }
 0x1c9   :  { %v3472_v15 = vadd.f32 %v896_v9, %v844_v13 }
 0x1ce   :  { %v847_v17 = vpop.f32.mrf.mxu2  ;;  %v904_v12 = vpop.f32.mrf.mxu3 }
 0x1cf   :  { %v848_v21 = vadd.f32 %v847_v17, %v783_v29 }
 0x1d1   :  { %v3474_v53 = vadd.f32 %v900_v41, %v848_v21 }
 0x1d6   :  { %v851_v25 = vpop.f32.mrf.mxu2  ;;  %v908_v20 = vpop.f32.mrf.mxu3 }
 0x1d7   :  { %v852_v52 = vadd.f32 %v851_v25, %v789_v40 }
 0x1d9   :  { %v3476_v63 = vadd.f32 %v904_v12, %v852_v52 }
 0x1de   :  { %v855_v43 = vpop.f32.mrf.mxu2  ;;  %v1054_v37 = vpop.f32.mrf.mxu3 }
 0x1df   :  { %v856_v30 = vadd.f32 %v855_v43, %v795_v56 }
 0x1e1   :  { %v3478_v31 = vadd.f32 %v908_v20, %v856_v30 }
 0x1e6   :  { %v1027_v35 = vpop.f32.mrf.mxu2 }
 0x1e7   :  { %v1028_v33 = vadd.f32 %v1027_v35, %v998_v18 }
 0x1e9   :  { %v1055_v29 = vadd.f32 %v1054_v37, %v1028_v33 }
 0x1eb   :  { %v1088_v55 = vadd.f32 %v1087_v38, %v1055_v29 }
 0x1ed   :  { %v1113_v42 = vadd.f32 %v1112_v49, %v1088_v55 }
 0x1ef   :  { %v1115_v47 = vadd.f32 %v1113_v42, %v881_v61 }
 0x1f1   :  { %3010 = vtanh.f32 %v1115_v47  ;;  %v2990_v57 = vmul.f32 -1.442695, %v1115_v47 }
 0x1f3   :  { %3012 = vpow2.f32 %v2990_v57 }
 0x1f7   :  { %v3011_v40 = vpop.eup %3010 }
 0x1f8   :  { %1138 = vrot.lane.b32.xlu0 %v3011_v40, %s3135_s3 }
 0x1f9   :  { %v3013_v45 = vpop.eup %3012 }
 0x1fa   :  { %v1119_v48 = vadd.f32 1.0, %v3013_v45 }
 0x1fc   :  { %3014 = vrcp.f32 %v1119_v48  ;;  %v1131_v62 = vand.u32 2147483648, %v1119_v48  ;;  %vm1125_vm3 = vweird.f32 %v1119_v48  ;;  %v1129_v0 = vand.u32 2147483647, %v1119_v48 }
 0x1fe   :  { %v1132_v2 = vor.u32 1.1754944e-38, %v1131_v62  ;;  %vm1130_vm5 = vcmp.eq.f32.partialorder %v1129_v0, 8.507059e+37 }
 0x202   :  { %v3015_v56 = vpop.eup %3014 }
 0x203   :  { %v1121_v36 = vmul.f32 %v3015_v56, %v1119_v48  ;;  %vm1126_vm2 = vweird.f32 %v3015_v56 }
 0x204   :  { %vm1127_vm4 = vmor %vm1125_vm3, %vm1126_vm2 }
 0x205   :  { %v1122_v58 = vsub.f32 1.0, %v1121_v36 }
 0x207   :  { %v1123_v59 = vmul.f32 %v3015_v56, %v1122_v58 }
 0x209   :  { %v1124_v39 = vadd.f32 %v3015_v56, %v1123_v59 }
 0x20b   :  { %v1128_v61 = vsel %vm1127_vm4, %v3015_v56, %v1124_v39 }
 0x20c   :  { %v1133_v6 = vsel %vm1130_vm5, %v1132_v2, %v1128_v61 }
 0x20d   :  { %v1136_v8 = vmul.f32 0.0, %v1133_v6 }
 0x26a   :  { %v1139_v4 = vpop.permute.xlu0 %1138 }
 0x26b   :  { %v1141_v32 = vmul.f32 %v1139_v4, %v1133_v6 }
 0x26d   :  { %1143 = vrot.lane.b32.xlu0 %v1141_v32, %s3135_s3 }
 0x2df   :  { %v1144_v9 = vpop.permute.xlu0 %1143 }
 0x2e0   :  { %v3482_v11 = vadd.f32 %v1144_v9, %v1136_v8 }
 0x2e2   :  { %3016 = vtanh.f32 %v3482_v11 }
 0x2e8   :  { %v3017_v13 = vpop.eup %3016 }
 0x2e9   :  { %1149 = vrot.lane.b32.xlu1 %v3017_v13, %s3135_s3 }
 0x35b   :  { %v1150_v41 = vpop.permute.xlu1 %1149 }
 0x35c   :  { %v1152_v17 = vmul.f32 %v1150_v41, %v1133_v6 }
 0x35e   :  { %1155 = vrot.lane.b32.xlu1 %v1152_v17, %s3136_s11 }
 0x3d0   :  { %v1156_v21 = vpop.permute.xlu1 %1155 }
 0x3d1   :  { %v1157_v12 = vsel %vm484_vm1, %v1156_v21, 0 }
 0x3d2   :  { %v1179_v25 = vand.u32 4294901760, %v1157_v12 }
 0x3d4   :  { %v1180_v52 = vsub.f32 %v1157_v12, %v1179_v25  ;;  %1225 = vmatmul.f32.vlgmr.msra.gmra.mxu3 %v1179_v25 }
 0x3d5   :  { %1501 = vmatpush.msra.mxu3 %v3326_v44 }
 0x3d6   :  { %v1181_v5 = vand.u32 4294901760, %v1180_v52  ;;  %1255 = vmatmul.f32.vlgmr.msrb.gmra.mxu0 %v1180_v52 }
 0x3d7   :  { %1503 = vmatpush.msra.mxu3 %v3355_v46  ;;  %1530 = vmatpush.msrb.mxu0 %v3336_v60 }
 0x3d8   :  { %v1182_v20 = vsub.f32 %v1180_v52, %v1181_v5  ;;  %1282 = vmatmul.f32.vlgmr.msrb.gmra.mxu1 %v1181_v5 }
 0x3d9   :  { %1505 = vmatpush.msra.mxu3 %v3377_v22  ;;  %1561 = vmatpush.msrb.mxu1 %v3326_v44 }
 0x3da   :  { %v1183_v43 = vand.u32 4294901760, %v1182_v20  ;;  %1534 = vmatpush.msrb.mxu0 %v3364_v16 }
 0x3db   :  { %1507 = vmatpush.msra.mxu3 %v3400_v26  ;;  %1563 = vmatpush.msrb.mxu1 %v3355_v46 }
 0x3dc   :  { %1184 = vmatmul.f32.vlgmr.msra.gmra.mxu2 %v1183_v43  ;;  %1340 = vmatmul.f32.vlgmr.msrb.gmra.mxu3 %v1179_v25 }
 0x3dd   :  { %1472 = vmatpush.msra.mxu2 %v3329_v54  ;;  %1565 = vmatpush.msrb.mxu1 %v3377_v22 }
 0x3de   :  { %1538 = vmatpush.msrb.mxu0 %v3386_v24  ;;  %1663 = vmatpush.msrb.mxu3 %v3344_v3 }
 0x3df   :  { %1475 = vmatpush.msra.mxu2 %v3358_v14  ;;  %1567 = vmatpush.msrb.mxu1 %v3400_v26 }
 0x3e0   :  { %1542 = vmatpush.msrb.mxu0 %v3411_v27  ;;  %1669 = vmatpush.msrb.mxu3 %v3369_v19 }
 0x3e1   :  { %1478 = vmatpush.msra.mxu2 %v3380_v23 }
 0x3e2   :  { %1675 = vmatpush.msrb.mxu3 %v3392_v50 }
 0x3e3   :  { %1481 = vmatpush.msra.mxu2 %v3403_v28 }
 0x3e4   :  { %1315 = vmatmul.f32.vlgmr.msrb.gmra.mxu2 %v1179_v25  ;;  %1681 = vmatpush.msrb.mxu3 %v3420_v51 }
 0x3e5   :  { %1630 = vmatpush.msrb.mxu2 %v3326_v44 }
 0x3e7   :  { %1632 = vmatpush.msrb.mxu2 %v3355_v46 }
 0x3e9   :  { %1634 = vmatpush.msrb.mxu2 %v3377_v22 }
 0x3eb   :  { %1636 = vmatpush.msrb.mxu2 %v3400_v26 }
 0x453   :  { %v1256_v35 = vpop.f32.mrf.mxu0 }
 0x455   :  { %v1283_v33 = vpop.f32.mrf.mxu1 }
 0x457   :  { %v1226_v30 = vpop.f32.mrf.mxu3 }
 0x45f   :  { %v1185_v34 = vpop.f32.mrf.mxu2  ;;  %v1341_v55 = vpop.f32.mrf.mxu3 }
 0x460   :  { %v1227_v18 = vadd.f32 %v1226_v30, %v1185_v34 }
 0x462   :  { %v1257_v37 = vadd.f32 %v1256_v35, %v1227_v18 }
 0x464   :  { %v1284_v38 = vadd.f32 %v1283_v33, %v1257_v37 }
 0x467   :  { %v1316_v29 = vpop.f32.mrf.mxu2 }
 0x468   :  { %v1317_v49 = vadd.f32 %v1316_v29, %v1284_v38 }
 0x46a   :  { %v1342_v42 = vadd.f32 %v1341_v55, %v1317_v49 }
 0x46c   :  { %v1344_v47 = vadd.f32 %v1342_v42, %v3466_v1 }
 0x46e   :  { %3018 = vtanh.f32 %v1344_v47  ;;  %v2991_v57 = vmul.f32 -1.442695, %v1344_v47 }
 0x470   :  { %3020 = vpow2.f32 %v2991_v57 }
 0x474   :  { %v3019_v40 = vpop.eup %3018 }
 0x475   :  { %1367 = vrot.lane.b32.xlu2 %v3019_v40, %s3135_s3 }
 0x476   :  { %v3021_v45 = vpop.eup %3020 }
 0x477   :  { %v1348_v48 = vadd.f32 1.0, %v3021_v45 }
 0x479   :  { %3022 = vrcp.f32 %v1348_v48  ;;  %v1360_v62 = vand.u32 2147483648, %v1348_v48  ;;  %vm1354_vm7 = vweird.f32 %v1348_v48  ;;  %v1358_v0 = vand.u32 2147483647, %v1348_v48 }
 0x47b   :  { %v1361_v61 = vor.u32 1.1754944e-38, %v1360_v62  ;;  %vm1359_vm9 = vcmp.eq.f32.partialorder %v1358_v0, 8.507059e+37 }
 0x47f   :  { %v3023_v56 = vpop.eup %3022 }
 0x480   :  { %v1350_v36 = vmul.f32 %v3023_v56, %v1348_v48  ;;  %vm1355_vm6 = vweird.f32 %v3023_v56 }
 0x481   :  { %vm1356_vm8 = vmor %vm1354_vm7, %vm1355_vm6 }
 0x482   :  { %v1351_v58 = vsub.f32 1.0, %v1350_v36 }
 0x484   :  { %v1352_v59 = vmul.f32 %v3023_v56, %v1351_v58 }
 0x486   :  { %v1353_v39 = vadd.f32 %v3023_v56, %v1352_v59 }
 0x488   :  { %v1357_v1 = vsel %vm1356_vm8, %v3023_v56, %v1353_v39 }
 0x489   :  { %v1362_v4 = vsel %vm1359_vm9, %v1361_v61, %v1357_v1 }
 0x48a   :  { %v1365_v32 = vmul.f32 %v1362_v4, %v3482_v11 }
 0x4cf   :  { %v1368_v2 = vpop.permute.xlu2 %1367 }
 0x4d0   :  { %v1370_v6 = vmul.f32 %v1368_v2, %v1362_v4 }
 0x4d2   :  { %1372 = vrot.lane.b32.xlu2 %v1370_v6, %s3135_s3 }
 0x52c   :  { %v1373_v8 = vpop.permute.xlu2 %1372 }
 0x52d   :  { %v3516_v9 = vadd.f32 %v1373_v8, %v1365_v32 }
 0x52f   :  { %3024 = vtanh.f32 %v3516_v9 }
 0x535   :  { %v3025_v13 = vpop.eup %3024 }
 0x536   :  { %1378 = vrot.lane.b32.xlu0 %v3025_v13, %s3135_s3 }
 0x5a8   :  { %v1379_v41 = vpop.permute.xlu0 %1378 }
 0x5a9   :  { %v1381_v17 = vmul.f32 %v1379_v41, %v1362_v4 }
 0x5ab   :  { %1384 = vrot.lane.b32.xlu1 %v1381_v17, %s3136_s11 }
 0x61d   :  { %v1385_v21 = vpop.permute.xlu1 %1384 }
 0x61e   :  { %v1386_v12 = vsel %vm484_vm1, %v1385_v21, 0 }
 0x61f   :  { %v1408_v25 = vand.u32 4294901760, %v1386_v12 }
 0x621   :  { %v1409_v52 = vsub.f32 %v1386_v12, %v1408_v25  ;;  %1454 = vmatmul.f32.vlgmr.msra.gmra.mxu1 %v1408_v25 }
 0x622   :  { %1730 = vmatpush.msra.mxu1 %v3326_v44 }
 0x623   :  { %v1410_v11 = vand.u32 4294901760, %v1409_v52  ;;  %1484 = vmatmul.f32.vlgmr.msra.gmra.mxu2 %v1409_v52 }
 0x624   :  { %1732 = vmatpush.msra.mxu1 %v3355_v46  ;;  %1759 = vmatpush.msra.mxu2 %v3336_v60 }
 0x625   :  { %v1411_v5 = vsub.f32 %v1409_v52, %v1410_v11  ;;  %1511 = vmatmul.f32.vlgmr.msra.gmra.mxu3 %v1410_v11 }
 0x626   :  { %1734 = vmatpush.msra.mxu1 %v3377_v22  ;;  %1790 = vmatpush.msra.mxu3 %v3326_v44 }
 0x627   :  { %v1412_v20 = vand.u32 4294901760, %v1411_v5  ;;  %1763 = vmatpush.msra.mxu2 %v3364_v16 }
 0x628   :  { %1736 = vmatpush.msra.mxu1 %v3400_v26  ;;  %1792 = vmatpush.msra.mxu3 %v3355_v46 }
 0x629   :  { %1413 = vmatmul.f32.vlgmr.msra.gmra.mxu0 %v1412_v20  ;;  %1569 = vmatmul.f32.vlgmr.msrb.gmra.mxu1 %v1408_v25 }
 0x62a   :  { %1701 = vmatpush.msra.mxu0 %v3329_v54  ;;  %1794 = vmatpush.msra.mxu3 %v3377_v22 }
 0x62b   :  { %1767 = vmatpush.msra.mxu2 %v3386_v24  ;;  %1892 = vmatpush.msrb.mxu1 %v3344_v3 }
 0x62c   :  { %1704 = vmatpush.msra.mxu0 %v3358_v14  ;;  %1796 = vmatpush.msra.mxu3 %v3400_v26 }
 0x62d   :  { %1771 = vmatpush.msra.mxu2 %v3411_v27  ;;  %1898 = vmatpush.msrb.mxu1 %v3369_v19 }
 0x62e   :  { %1707 = vmatpush.msra.mxu0 %v3380_v23 }
 0x62f   :  { %1904 = vmatpush.msrb.mxu1 %v3392_v50 }
 0x630   :  { %1710 = vmatpush.msra.mxu0 %v3403_v28 }
 0x631   :  { %1544 = vmatmul.f32.vlgmr.msrb.gmra.mxu0 %v1408_v25  ;;  %1910 = vmatpush.msrb.mxu1 %v3420_v51 }
 0x632   :  { %1859 = vmatpush.msrb.mxu0 %v3326_v44 }
 0x634   :  { %1861 = vmatpush.msrb.mxu0 %v3355_v46 }
 0x636   :  { %1863 = vmatpush.msrb.mxu0 %v3377_v22 }
 0x638   :  { %1865 = vmatpush.msrb.mxu0 %v3400_v26 }
 0x69e   :  { %v1455_v43 = vpop.f32.mrf.mxu1 }
 0x6a6   :  { %v1414_v30 = vpop.f32.mrf.mxu0  ;;  %v1485_v18 = vpop.f32.mrf.mxu2 }
 0x6a7   :  { %v1456_v34 = vadd.f32 %v1455_v43, %v1414_v30  ;;  %v1570_v49 = vpop.f32.mrf.mxu1 }
 0x6a8   :  { %v1512_v37 = vpop.f32.mrf.mxu3 }
 0x6a9   :  { %v1486_v35 = vadd.f32 %v1485_v18, %v1456_v34 }
 0x6ab   :  { %v1513_v33 = vadd.f32 %v1512_v37, %v1486_v35 }
 0x6ae   :  { %v1545_v38 = vpop.f32.mrf.mxu0 }
 0x6af   :  { %v1546_v29 = vadd.f32 %v1545_v38, %v1513_v33 }
 0x6b1   :  { %v1571_v55 = vadd.f32 %v1570_v49, %v1546_v29 }
 0x6b3   :  { %v1573_v42 = vadd.f32 %v1571_v55, %v3468_v7 }
 0x6b5   :  { %3026 = vtanh.f32 %v1573_v42  ;;  %v2992_v40 = vmul.f32 -1.442695, %v1573_v42 }
 0x6b7   :  { %3028 = vpow2.f32 %v2992_v40 }
 0x6bb   :  { %v3027_v47 = vpop.eup %3026 }
 0x6bc   :  { %1596 = vrot.lane.b32.xlu2 %v3027_v47, %s3135_s3 }
 0x6bd   :  { %v3029_v57 = vpop.eup %3028 }
 0x6be   :  { %v1577_v45 = vadd.f32 1.0, %v3029_v57 }
 0x6c0   :  { %3030 = vrcp.f32 %v1577_v45  ;;  %v1589_v39 = vand.u32 2147483648, %v1577_v45  ;;  %vm1583_vm11 = vweird.f32 %v1577_v45  ;;  %v1587_v62 = vand.u32 2147483647, %v1577_v45 }
 0x6c2   :  { %v1590_v0 = vor.u32 1.1754944e-38, %v1589_v39  ;;  %vm1588_vm13 = vcmp.eq.f32.partialorder %v1587_v62, 8.507059e+37 }
 0x6c6   :  { %v3031_v48 = vpop.eup %3030 }
 0x6c7   :  { %v1579_v56 = vmul.f32 %v3031_v48, %v1577_v45  ;;  %vm1584_vm10 = vweird.f32 %v3031_v48 }
 0x6c8   :  { %vm1585_vm12 = vmor %vm1583_vm11, %vm1584_vm10 }
 0x6c9   :  { %v1580_v36 = vsub.f32 1.0, %v1579_v56 }
 0x6cb   :  { %v1581_v58 = vmul.f32 %v3031_v48, %v1580_v36 }
 0x6cd   :  { %v1582_v59 = vadd.f32 %v3031_v48, %v1581_v58 }
 0x6cf   :  { %v1586_v7 = vsel %vm1585_vm12, %v3031_v48, %v1582_v59 }
 0x6d0   :  { %v1591_v61 = vsel %vm1588_vm13, %v1590_v0, %v1586_v7 }
 0x6d1   :  { %v1594_v4 = vmul.f32 %v1591_v61, %v3516_v9 }
 0x716   :  { %v1597_v1 = vpop.permute.xlu2 %1596 }
 0x717   :  { %v1599_v2 = vmul.f32 %v1597_v1, %v1591_v61 }
 0x719   :  { %1601 = vrot.lane.b32.xlu0 %v1599_v2, %s3135_s3 }
 0x78b   :  { %v1602_v6 = vpop.permute.xlu0 %1601 }
 0x78c   :  { %v3550_v32 = vadd.f32 %v1602_v6, %v1594_v4 }
 0x78e   :  { %3032 = vtanh.f32 %v3550_v32 }
 0x794   :  { %v3033_v8 = vpop.eup %3032 }
 0x795   :  { %1607 = vrot.lane.b32.xlu1 %v3033_v8, %s3135_s3 }
 0x807   :  { %v1608_v13 = vpop.permute.xlu1 %1607 }
 0x808   :  { %v1610_v41 = vmul.f32 %v1608_v13, %v1591_v61 }
 0x80a   :  { %1613 = vrot.lane.b32.xlu2 %v1610_v41, %s3136_s11 }
 0x864   :  { %v1614_v17 = vpop.permute.xlu2 %1613 }
 0x865   :  { %v1615_v21 = vsel %vm484_vm1, %v1614_v17, 0 }
 0x866   :  { %v1637_v12 = vand.u32 4294901760, %v1615_v21 }
 0x868   :  { %v1638_v25 = vsub.f32 %v1615_v21, %v1637_v12  ;;  %1683 = vmatmul.f32.vlgmr.msrb.gmra.mxu3 %v1637_v12 }
 0x869   :  { %1959 = vmatpush.msrb.mxu3 %v3326_v44 }
 0x86a   :  { %v1639_v9 = vand.u32 4294901760, %v1638_v25  ;;  %1713 = vmatmul.f32.vlgmr.msra.gmra.mxu0 %v1638_v25 }
 0x86b   :  { %1961 = vmatpush.msrb.mxu3 %v3355_v46  ;;  %1988 = vmatpush.msra.mxu0 %v3336_v60 }
 0x86c   :  { %v1640_v52 = vsub.f32 %v1638_v25, %v1639_v9  ;;  %1740 = vmatmul.f32.vlgmr.msra.gmra.mxu1 %v1639_v9 }
 0x86d   :  { %1963 = vmatpush.msrb.mxu3 %v3377_v22  ;;  %2019 = vmatpush.msra.mxu1 %v3326_v44 }
 0x86e   :  { %v1641_v11 = vand.u32 4294901760, %v1640_v52  ;;  %1992 = vmatpush.msra.mxu0 %v3364_v16 }
 0x86f   :  { %1965 = vmatpush.msrb.mxu3 %v3400_v26  ;;  %2021 = vmatpush.msra.mxu1 %v3355_v46 }
 0x870   :  { %1642 = vmatmul.f32.vlgmr.msrb.gmra.mxu2 %v1641_v11  ;;  %1798 = vmatmul.f32.vlgmr.msra.gmra.mxu3 %v1637_v12 }
 0x871   :  { %1930 = vmatpush.msrb.mxu2 %v3329_v54  ;;  %2023 = vmatpush.msra.mxu1 %v3377_v22 }
 0x872   :  { %1996 = vmatpush.msra.mxu0 %v3386_v24  ;;  %2121 = vmatpush.msra.mxu3 %v3344_v3 }
 0x873   :  { %1933 = vmatpush.msrb.mxu2 %v3358_v14  ;;  %2025 = vmatpush.msra.mxu1 %v3400_v26 }
 0x874   :  { %2000 = vmatpush.msra.mxu0 %v3411_v27  ;;  %2127 = vmatpush.msra.mxu3 %v3369_v19 }
 0x875   :  { %1936 = vmatpush.msrb.mxu2 %v3380_v23 }
 0x876   :  { %2133 = vmatpush.msra.mxu3 %v3392_v50 }
 0x877   :  { %1939 = vmatpush.msrb.mxu2 %v3403_v28 }
 0x878   :  { %1773 = vmatmul.f32.vlgmr.msra.gmra.mxu2 %v1637_v12  ;;  %2139 = vmatpush.msra.mxu3 %v3420_v51 }
 0x879   :  { %2088 = vmatpush.msra.mxu2 %v3326_v44 }
 0x87b   :  { %2090 = vmatpush.msra.mxu2 %v3355_v46 }
 0x87d   :  { %2092 = vmatpush.msra.mxu2 %v3377_v22 }
 0x87f   :  { %2094 = vmatpush.msra.mxu2 %v3400_v26 }
 0x8e7   :  { %v1714_v30 = vpop.f32.mrf.mxu0 }
 0x8e9   :  { %v1741_v18 = vpop.f32.mrf.mxu1 }
 0x8eb   :  { %v1684_v5 = vpop.f32.mrf.mxu3 }
 0x8f3   :  { %v1643_v20 = vpop.f32.mrf.mxu2  ;;  %v1799_v38 = vpop.f32.mrf.mxu3 }
 0x8f4   :  { %v1685_v43 = vadd.f32 %v1684_v5, %v1643_v20 }
 0x8f6   :  { %v1715_v34 = vadd.f32 %v1714_v30, %v1685_v43 }
 0x8f8   :  { %v1742_v35 = vadd.f32 %v1741_v18, %v1715_v34 }
 0x8fb   :  { %v1774_v37 = vpop.f32.mrf.mxu2 }
 0x8fc   :  { %v1775_v33 = vadd.f32 %v1774_v37, %v1742_v35 }
 0x8fe   :  { %v1800_v29 = vadd.f32 %v1799_v38, %v1775_v33 }
 0x900   :  { %v1802_v49 = vadd.f32 %v1800_v29, %v3470_v10 }
 0x902   :  { %3034 = vtanh.f32 %v1802_v49  ;;  %v2993_v42 = vmul.f32 -1.442695, %v1802_v49 }
 0x904   :  { %3036 = vpow2.f32 %v2993_v42 }
 0x908   :  { %v3035_v55 = vpop.eup %3034 }
 0x909   :  { %1825 = vrot.lane.b32.xlu0 %v3035_v55, %s3135_s3 }
 0x90a   :  { %v3037_v47 = vpop.eup %3036 }
 0x90b   :  { %v1806_v40 = vadd.f32 1.0, %v3037_v47 }
 0x90d   :  { %3038 = vrcp.f32 %v1806_v40  ;;  %v1818_v58 = vand.u32 2147483648, %v1806_v40  ;;  %vm1812_vm15 = vweird.f32 %v1806_v40  ;;  %v1816_v59 = vand.u32 2147483647, %v1806_v40 }
 0x90f   :  { %v1819_v39 = vor.u32 1.1754944e-38, %v1818_v58  ;;  %vm1817_vm2 = vcmp.eq.f32.partialorder %v1816_v59, 8.507059e+37 }
 0x913   :  { %v3039_v57 = vpop.eup %3038 }
 0x914   :  { %v1808_v45 = vmul.f32 %v3039_v57, %v1806_v40  ;;  %vm1813_vm14 = vweird.f32 %v3039_v57 }
 0x915   :  { %vm1814_vm0 = vmor %vm1812_vm15, %vm1813_vm14 }
 0x916   :  { %v1809_v48 = vsub.f32 1.0, %v1808_v45 }
 0x918   :  { %v1810_v56 = vmul.f32 %v3039_v57, %v1809_v48 }
 0x91a   :  { %v1811_v36 = vadd.f32 %v3039_v57, %v1810_v56 }
 0x91c   :  { %v1815_v10 = vsel %vm1814_vm0, %v3039_v57, %v1811_v36 }
 0x91d   :  { %v1820_v7 = vsel %vm1817_vm2, %v1819_v39, %v1815_v10 }
 0x91e   :  { %v1823_v1 = vmul.f32 %v1820_v7, %v3550_v32 }
 0x97b   :  { %v1826_v62 = vpop.permute.xlu0 %1825 }
 0x97c   :  { %v1828_v0 = vmul.f32 %v1826_v62, %v1820_v7 }
 0x97e   :  { %1830 = vrot.lane.b32.xlu1 %v1828_v0, %s3135_s3 }
 0x9f0   :  { %v1831_v61 = vpop.permute.xlu1 %1830 }
 0x9f1   :  { %v3584_v2 = vadd.f32 %v1831_v61, %v1823_v1 }
 0x9f3   :  { %3040 = vtanh.f32 %v3584_v2 }
 0x9f9   :  { %v3041_v4 = vpop.eup %3040 }
 0x9fa   :  { %1836 = vrot.lane.b32.xlu2 %v3041_v4, %s3135_s3 }
 0xa54   :  { %v1837_v6 = vpop.permute.xlu2 %1836 }
 0xa55   :  { %v1839_v8 = vmul.f32 %v1837_v6, %v1820_v7 }
 0xa57   :  { %1842 = vrot.lane.b32.xlu0 %v1839_v8, %s3136_s11 }
 0xac9   :  { %v1843_v13 = vpop.permute.xlu0 %1842 }
 0xaca   :  { %v1844_v41 = vsel %vm484_vm1, %v1843_v13, 0 }
 0xacb   :  { %v1866_v17 = vand.u32 4294901760, %v1844_v41 }
 0xacd   :  { %v1867_v21 = vsub.f32 %v1844_v41, %v1866_v17  ;;  %1912 = vmatmul.f32.vlgmr.msrb.gmra.mxu1 %v1866_v17 }
 0xace   :  { %2188 = vmatpush.msrb.mxu1 %v3326_v44 }
 0xacf   :  { %v1868_v32 = vand.u32 4294901760, %v1867_v21  ;;  %1942 = vmatmul.f32.vlgmr.msrb.gmra.mxu2 %v1867_v21 }
 0xad0   :  { %2190 = vmatpush.msrb.mxu1 %v3355_v46  ;;  %2217 = vmatpush.msrb.mxu2 %v3336_v60 }
 0xad1   :  { %v1869_v12 = vsub.f32 %v1867_v21, %v1868_v32  ;;  %1969 = vmatmul.f32.vlgmr.msrb.gmra.mxu3 %v1868_v32 }
 0xad2   :  { %2192 = vmatpush.msrb.mxu1 %v3377_v22  ;;  %2248 = vmatpush.msrb.mxu3 %v3326_v44 }
 0xad3   :  { %v1870_v25 = vand.u32 4294901760, %v1869_v12  ;;  %2221 = vmatpush.msrb.mxu2 %v3364_v16 }
 0xad4   :  { %2194 = vmatpush.msrb.mxu1 %v3400_v26  ;;  %2250 = vmatpush.msrb.mxu3 %v3355_v46 }
 0xad5   :  { %1871 = vmatmul.f32.vlgmr.msrb.gmra.mxu0 %v1870_v25  ;;  %2027 = vmatmul.f32.vlgmr.msra.gmra.mxu1 %v1866_v17 }
 0xad6   :  { %2159 = vmatpush.msrb.mxu0 %v3329_v54  ;;  %2252 = vmatpush.msrb.mxu3 %v3377_v22 }
 0xad7   :  { %2225 = vmatpush.msrb.mxu2 %v3386_v24  ;;  %2350 = vmatpush.msra.mxu1 %v3344_v3 }
 0xad8   :  { %2162 = vmatpush.msrb.mxu0 %v3358_v14  ;;  %2254 = vmatpush.msrb.mxu3 %v3400_v26 }
 0xad9   :  { %2229 = vmatpush.msrb.mxu2 %v3411_v27  ;;  %2356 = vmatpush.msra.mxu1 %v3369_v19 }
 0xada   :  { %2165 = vmatpush.msrb.mxu0 %v3380_v23 }
 0xadb   :  { %2362 = vmatpush.msra.mxu1 %v3392_v50 }
 0xadc   :  { %2168 = vmatpush.msrb.mxu0 %v3403_v28 }
 0xadd   :  { %2002 = vmatmul.f32.vlgmr.msra.gmra.mxu0 %v1866_v17  ;;  %2368 = vmatpush.msra.mxu1 %v3420_v51 }
 0xade   :  { %2317 = vmatpush.msra.mxu0 %v3326_v44 }
 0xae0   :  { %2319 = vmatpush.msra.mxu0 %v3355_v46 }
 0xae2   :  { %2321 = vmatpush.msra.mxu0 %v3377_v22 }
 0xae4   :  { %2323 = vmatpush.msra.mxu0 %v3400_v26 }
 0xb4a   :  { %v1913_v9 = vpop.f32.mrf.mxu1 }
 0xb52   :  { %v1872_v52 = vpop.f32.mrf.mxu0  ;;  %v1943_v5 = vpop.f32.mrf.mxu2 }
 0xb53   :  { %v1914_v11 = vadd.f32 %v1913_v9, %v1872_v52  ;;  %v2028_v35 = vpop.f32.mrf.mxu1 }
 0xb54   :  { %v1970_v43 = vpop.f32.mrf.mxu3 }
 0xb55   :  { %v1944_v20 = vadd.f32 %v1943_v5, %v1914_v11 }
 0xb57   :  { %v1971_v30 = vadd.f32 %v1970_v43, %v1944_v20 }
 0xb5a   :  { %v2003_v34 = vpop.f32.mrf.mxu0 }
 0xb5b   :  { %v2004_v18 = vadd.f32 %v2003_v34, %v1971_v30 }
 0xb5d   :  { %v2029_v37 = vadd.f32 %v2028_v35, %v2004_v18 }
 0xb5f   :  { %v2031_v33 = vadd.f32 %v2029_v37, %v3472_v15 }
 0xb61   :  { %3042 = vtanh.f32 %v2031_v33  ;;  %v2994_v29 = vmul.f32 -1.442695, %v2031_v33 }
 0xb63   :  { %3044 = vpow2.f32 %v2994_v29 }
 0xb67   :  { %v3043_v38 = vpop.eup %3042 }
 0xb68   :  { %2054 = vrot.lane.b32.xlu1 %v3043_v38, %s3135_s3 }
 0xb69   :  { %v3045_v49 = vpop.eup %3044 }
 0xb6a   :  { %v2035_v55 = vadd.f32 1.0, %v3045_v49 }
 0xb6c   :  { %3046 = vrcp.f32 %v2035_v55  ;;  %v2047_v48 = vand.u32 2147483648, %v2035_v55  ;;  %vm2041_vm4 = vweird.f32 %v2035_v55  ;;  %v2045_v56 = vand.u32 2147483647, %v2035_v55 }
 0xb6e   :  { %v2048_v36 = vor.u32 1.1754944e-38, %v2047_v48  ;;  %vm2046_vm6 = vcmp.eq.f32.partialorder %v2045_v56, 8.507059e+37 }
 0xb72   :  { %v3047_v42 = vpop.eup %3046 }
 0xb73   :  { %v2037_v47 = vmul.f32 %v3047_v42, %v2035_v55  ;;  %vm2042_vm3 = vweird.f32 %v3047_v42 }
 0xb74   :  { %vm2043_vm5 = vmor %vm2041_vm4, %vm2042_vm3 }
 0xb75   :  { %v2038_v40 = vsub.f32 1.0, %v2037_v47 }
 0xb77   :  { %v2039_v57 = vmul.f32 %v3047_v42, %v2038_v40 }
 0xb79   :  { %v2040_v45 = vadd.f32 %v3047_v42, %v2039_v57 }
 0xb7b   :  { %v2044_v15 = vsel %vm2043_vm5, %v3047_v42, %v2040_v45 }
 0xb7c   :  { %v2049_v59 = vsel %vm2046_vm6, %v2048_v36, %v2044_v15 }
 0xb7d   :  { %v2052_v39 = vmul.f32 %v2049_v59, %v3584_v2 }
 0xbda   :  { %v2055_v58 = vpop.permute.xlu1 %2054 }
 0xbdb   :  { %v2057_v10 = vmul.f32 %v2055_v58, %v2049_v59 }
 0xbdd   :  { %2059 = vrot.lane.b32.xlu2 %v2057_v10, %s3135_s3 }
 0xc37   :  { %v2060_v62 = vpop.permute.xlu2 %2059 }
 0xc38   :  { %v3618_v7 = vadd.f32 %v2060_v62, %v2052_v39 }
 0xc3a   :  { %3048 = vtanh.f32 %v3618_v7 }
 0xc40   :  { %v3049_v0 = vpop.eup %3048 }
 0xc41   :  { %2065 = vrot.lane.b32.xlu0 %v3049_v0, %s3135_s3 }
 0xcb3   :  { %v2066_v1 = vpop.permute.xlu0 %2065 }
 0xcb4   :  { %v2068_v61 = vmul.f32 %v2066_v1, %v2049_v59 }
 0xcb6   :  { %2071 = vrot.lane.b32.xlu1 %v2068_v61, %s3136_s11 }
 0xd28   :  { %v2072_v4 = vpop.permute.xlu1 %2071 }
 0xd29   :  { %v2073_v6 = vsel %vm484_vm1, %v2072_v4, 0 }
 0xd2a   :  { %v2095_v8 = vand.u32 4294901760, %v2073_v6 }
 0xd2c   :  { %v2096_v13 = vsub.f32 %v2073_v6, %v2095_v8  ;;  %2141 = vmatmul.f32.vlgmr.msra.gmra.mxu3 %v2095_v8 }
 0xd2d   :  { %2417 = vmatpush.msra.mxu3 %v3326_v44 }
 0xd2e   :  { %v2097_v2 = vand.u32 4294901760, %v2096_v13  ;;  %2171 = vmatmul.f32.vlgmr.msrb.gmra.mxu0 %v2096_v13 }
 0xd2f   :  { %2419 = vmatpush.msra.mxu3 %v3355_v46  ;;  %2446 = vmatpush.msrb.mxu0 %v3336_v60 }
 0xd30   :  { %v2098_v41 = vsub.f32 %v2096_v13, %v2097_v2  ;;  %2198 = vmatmul.f32.vlgmr.msrb.gmra.mxu1 %v2097_v2 }
 0xd31   :  { %2421 = vmatpush.msra.mxu3 %v3377_v22  ;;  %2477 = vmatpush.msrb.mxu1 %v3326_v44 }
 0xd32   :  { %v2099_v17 = vand.u32 4294901760, %v2098_v41  ;;  %2450 = vmatpush.msrb.mxu0 %v3364_v16 }
 0xd33   :  { %2423 = vmatpush.msra.mxu3 %v3400_v26  ;;  %2479 = vmatpush.msrb.mxu1 %v3355_v46 }
 0xd34   :  { %2100 = vmatmul.f32.vlgmr.msra.gmra.mxu2 %v2099_v17  ;;  %2256 = vmatmul.f32.vlgmr.msrb.gmra.mxu3 %v2095_v8 }
 0xd35   :  { %2388 = vmatpush.msra.mxu2 %v3329_v54  ;;  %2481 = vmatpush.msrb.mxu1 %v3377_v22 }
 0xd36   :  { %2454 = vmatpush.msrb.mxu0 %v3386_v24  ;;  %2579 = vmatpush.msrb.mxu3 %v3344_v3 }
 0xd37   :  { %2391 = vmatpush.msra.mxu2 %v3358_v14  ;;  %2483 = vmatpush.msrb.mxu1 %v3400_v26 }
 0xd38   :  { %2458 = vmatpush.msrb.mxu0 %v3411_v27  ;;  %2585 = vmatpush.msrb.mxu3 %v3369_v19 }
 0xd39   :  { %2394 = vmatpush.msra.mxu2 %v3380_v23 }
 0xd3a   :  { %2591 = vmatpush.msrb.mxu3 %v3392_v50 }
 0xd3b   :  { %2397 = vmatpush.msra.mxu2 %v3403_v28 }
 0xd3c   :  { %2231 = vmatmul.f32.vlgmr.msrb.gmra.mxu2 %v2095_v8  ;;  %2597 = vmatpush.msrb.mxu3 %v3420_v51 }
 0xd3d   :  { %2546 = vmatpush.msrb.mxu2 %v3326_v44 }
 0xd3f   :  { %2548 = vmatpush.msrb.mxu2 %v3355_v46 }
 0xd41   :  { %2550 = vmatpush.msrb.mxu2 %v3377_v22 }
 0xd43   :  { %2552 = vmatpush.msrb.mxu2 %v3400_v26 }
 0xdab   :  { %v2172_v32 = vpop.f32.mrf.mxu0 }
 0xdad   :  { %v2199_v25 = vpop.f32.mrf.mxu1 }
 0xdaf   :  { %v2142_v3 = vpop.f32.mrf.mxu3 }
 0xdb7   :  { %v2101_v21 = vpop.f32.mrf.mxu2  ;;  %v2257_v11 = vpop.f32.mrf.mxu3 }
 0xdb8   :  { %v2143_v19 = vadd.f32 %v2142_v3, %v2101_v21 }
 0xdba   :  { %v2173_v12 = vadd.f32 %v2172_v32, %v2143_v19 }
 0xdbc   :  { %v2200_v50 = vadd.f32 %v2199_v25, %v2173_v12 }
 0xdbf   :  { %v2232_v9 = vpop.f32.mrf.mxu2 }
 0xdc0   :  { %v2233_v52 = vadd.f32 %v2232_v9, %v2200_v50 }
 0xdc2   :  { %v2258_v5 = vadd.f32 %v2257_v11, %v2233_v52 }
 0xdc4   :  { %v2260_v51 = vadd.f32 %v2258_v5, %v3474_v53 }
 0xdc6   :  { %3050 = vtanh.f32 %v2260_v51  ;;  %v2995_v43 = vmul.f32 -1.442695, %v2260_v51 }
 0xdc8   :  { %3052 = vpow2.f32 %v2995_v43 }
 0xdcc   :  { %v3051_v20 = vpop.eup %3050 }
 0xdcd   :  { %2283 = vrot.lane.b32.xlu2 %v3051_v20, %s3135_s3 }
 0xdce   :  { %v3053_v30 = vpop.eup %3052 }
 0xdcf   :  { %v2264_v34 = vadd.f32 1.0, %v3053_v30 }
 0xdd1   :  { %3054 = vrcp.f32 %v2264_v34  ;;  %v2276_v29 = vand.u32 2147483648, %v2264_v34  ;;  %vm2270_vm8 = vweird.f32 %v2264_v34  ;;  %v2274_v49 = vand.u32 2147483647, %v2264_v34 }
 0xdd3   :  { %v2277_v55 = vor.u32 1.1754944e-38, %v2276_v29  ;;  %vm2275_vm10 = vcmp.eq.f32.partialorder %v2274_v49, 8.507059e+37 }
 0xdd7   :  { %v3055_v18 = vpop.eup %3054 }
 0xdd8   :  { %v2266_v35 = vmul.f32 %v3055_v18, %v2264_v34  ;;  %vm2271_vm7 = vweird.f32 %v3055_v18 }
 0xdd9   :  { %vm2272_vm9 = vmor %vm2270_vm8, %vm2271_vm7 }
 0xdda   :  { %v2267_v37 = vsub.f32 1.0, %v2266_v35 }
 0xddc   :  { %v2268_v33 = vmul.f32 %v3055_v18, %v2267_v37 }
 0xdde   :  { %v2269_v38 = vadd.f32 %v3055_v18, %v2268_v33 }
 0xde0   :  { %v2273_v53 = vsel %vm2272_vm9, %v3055_v18, %v2269_v38 }
 0xde1   :  { %v2278_v47 = vsel %vm2275_vm10, %v2277_v55, %v2273_v53 }
 0xde2   :  { %v2281_v57 = vmul.f32 %v2278_v47, %v3618_v7 }
 0xe27   :  { %v2284_v42 = vpop.permute.xlu2 %2283 }
 0xe28   :  { %v2286_v40 = vmul.f32 %v2284_v42, %v2278_v47 }
 0xe2a   :  { %2288 = vrot.lane.b32.xlu0 %v2286_v40, %s3135_s3 }
 0xe9c   :  { %v2289_v45 = vpop.permute.xlu0 %2288 }
 0xe9d   :  { %v3652_v48 = vadd.f32 %v2289_v45, %v2281_v57 }
 0xe9f   :  { %3056 = vtanh.f32 %v3652_v48 }
 0xea5   :  { %v3057_v56 = vpop.eup %3056 }
 0xea6   :  { %2294 = vrot.lane.b32.xlu1 %v3057_v56, %s3135_s3 }
 0xf18   :  { %v2295_v15 = vpop.permute.xlu1 %2294 }
 0xf19   :  { %v2297_v36 = vmul.f32 %v2295_v15, %v2278_v47 }
 0xf1b   :  { %2300 = vrot.lane.b32.xlu2 %v2297_v36, %s3136_s11 }
 0xf75   :  { %v2301_v58 = vpop.permute.xlu2 %2300 }
 0xf76   :  { %v2302_v59 = vsel %vm484_vm1, %v2301_v58, 0 }
 0xf77   :  { %v2324_v10 = vand.u32 4294901760, %v2302_v59 }
 0xf79   :  { %v2325_v39 = vsub.f32 %v2302_v59, %v2324_v10  ;;  %2370 = vmatmul.f32.vlgmr.msra.gmra.mxu1 %v2324_v10 }
 0xf7a   :  { %2646 = vmatpush.msra.mxu1 %v3326_v44 }
 0xf7b   :  { %v2326_v62 = vand.u32 4294901760, %v2325_v39  ;;  %2400 = vmatmul.f32.vlgmr.msra.gmra.mxu2 %v2325_v39 }
 0xf7c   :  { %2648 = vmatpush.msra.mxu1 %v3355_v46  ;;  %2675 = vmatpush.msra.mxu2 %v3336_v60 }
 0xf7d   :  { %v2327_v7 = vsub.f32 %v2325_v39, %v2326_v62  ;;  %2427 = vmatmul.f32.vlgmr.msra.gmra.mxu3 %v2326_v62 }
 0xf7e   :  { %2650 = vmatpush.msra.mxu1 %v3377_v22  ;;  %2706 = vmatpush.msra.mxu3 %v3326_v44 }
 0xf7f   :  { %v2328_v0 = vand.u32 4294901760, %v2327_v7  ;;  %2679 = vmatpush.msra.mxu2 %v3364_v16 }
 0xf80   :  { %2652 = vmatpush.msra.mxu1 %v3400_v26  ;;  %2708 = vmatpush.msra.mxu3 %v3355_v46 }
 0xf81   :  { %2329 = vmatmul.f32.vlgmr.msra.gmra.mxu0 %v2328_v0  ;;  %2485 = vmatmul.f32.vlgmr.msrb.gmra.mxu1 %v2324_v10 }
 0xf82   :  { %2617 = vmatpush.msra.mxu0 %v3329_v54  ;;  %2710 = vmatpush.msra.mxu3 %v3377_v22 }
 0xf83   :  { %2683 = vmatpush.msra.mxu2 %v3386_v24 }
 0xf84   :  { %2620 = vmatpush.msra.mxu0 %v3358_v14  ;;  %2712 = vmatpush.msra.mxu3 %v3400_v26 }
 0xf85   :  { %2687 = vmatpush.msra.mxu2 %v3411_v27 }
 0xf86   :  { %2623 = vmatpush.msra.mxu0 %v3380_v23 }
 0xf88   :  { %2626 = vmatpush.msra.mxu0 %v3403_v28 }
 0xf89   :  { %2460 = vmatmul.f32.vlgmr.msrb.gmra.mxu0 %v2324_v10 }
 0xff6   :  { %v2371_v44 = vpop.f32.mrf.mxu1 }
 0xffe   :  { %v2330_v60 = vpop.f32.mrf.mxu0  ;;  %v2401_v16 = vpop.f32.mrf.mxu2 }
 0xfff   :  { %v2372_v46 = vadd.f32 %v2371_v44, %v2330_v60  ;;  %v2486_v4 = vpop.f32.mrf.mxu1 }
0x1000   :  { %v2428_v1 = vpop.f32.mrf.mxu3 }
0x1001   :  { %v2402_v54 = vadd.f32 %v2401_v16, %v2372_v46 }
0x1003   :  { %v2429_v22 = vadd.f32 %v2428_v1, %v2402_v54 }
0x1006   :  { %v2461_v61 = vpop.f32.mrf.mxu0 }
0x1007   :  { %v2462_v24 = vadd.f32 %v2461_v61, %v2429_v22 }
0x1009   :  { %v2487_v14 = vadd.f32 %v2486_v4, %v2462_v24  ;;  %v2759_v4 = vld [vmem:[%s3712_s4 + $0x18] sm:$0xff] }
0x100b   :  { %v2489_v26 = vadd.f32 %v2487_v14, %v3476_v63  ;;  %v2758_v14 = vld [vmem:[%s3712_s4 + $0x10] sm:$0xff] }
0x100d   :  { %3058 = vtanh.f32 %v2489_v26  ;;  %v2996_v23 = vmul.f32 -1.442695, %v2489_v26  ;;  %v2778_v26 = vand.u32 4294901760, %v2759_v4 }
0x100f   :  { %3060 = vpow2.f32 %v2996_v23  ;;  %v2808_v23 = vsub.f32 %v2759_v4, %v2778_v26  ;;  %2779 = vmatpush.msrb.mxu0 %v2778_v26 }
0x1013   :  { %v3059_v27 = vpop.eup %3058 }
0x1014   :  { %2512 = vrot.lane.b32.xlu0 %v3059_v27, %s3135_s3  ;;  %v2780_v27 = vand.u32 4294901760, %v2758_v14 }
0x1015   :  { %v3061_v28 = vpop.eup %3060 }
0x1016   :  { %v2493_v6 = vadd.f32 1.0, %v3061_v28  ;;  %v2814_v28 = vsub.f32 %v2758_v14, %v2780_v27  ;;  %2781 = vmatpush.msrb.mxu0 %v2780_v27 }
0x1018   :  { %3062 = vrcp.f32 %v2493_v6  ;;  %v2505_v3 = vand.u32 2147483648, %v2493_v6  ;;  %vm2499_vm12 = vweird.f32 %v2493_v6  ;;  %v2503_v21 = vand.u32 2147483647, %v2493_v6 }
0x101a   :  { %v2506_v19 = vor.u32 1.1754944e-38, %v2505_v3  ;;  %vm2504_vm14 = vcmp.eq.f32.partialorder %v2503_v21, 8.507059e+37 }
0x101e   :  { %v3063_v8 = vpop.eup %3062 }
0x101f   :  { %v2495_v13 = vmul.f32 %v3063_v8, %v2493_v6  ;;  %vm2500_vm11 = vweird.f32 %v3063_v8  ;;  %v2809_v6 = vand.u32 4294901760, %v2808_v23 }
0x1020   :  { %vm2501_vm13 = vmor %vm2499_vm12, %vm2500_vm11 }
0x1021   :  { %v2496_v2 = vsub.f32 1.0, %v2495_v13  ;;  %v2810_v13 = vsub.f32 %v2808_v23, %v2809_v6 }
0x1023   :  { %v2497_v41 = vmul.f32 %v3063_v8, %v2496_v2 }
0x1025   :  { %v2498_v17 = vadd.f32 %v3063_v8, %v2497_v41  ;;  %v2811_v41 = vand.u32 4294901760, %v2810_v13 }
0x1027   :  { %v2502_v63 = vsel %vm2501_vm13, %v3063_v8, %v2498_v17  ;;  %v2815_v8 = vand.u32 4294901760, %v2814_v28  ;;  %2812 = vmatpush.msrb.mxu1 %v2811_v41 }
0x1028   :  { %v2507_v12 = vsel %vm2504_vm14, %v2506_v19, %v2502_v63  ;;  %v2757_v63 = vld [vmem:[%s3712_s4 + $0x8] sm:$0xff] }
0x1029   :  { %v2510_v50 = vmul.f32 %v2507_v12, %v3652_v48  ;;  %v2816_v2 = vsub.f32 %v2814_v28, %v2815_v8  ;;  %v2782_v19 = vand.u32 4294901760, %v2757_v63 }
0x102b   :  { %v2817_v17 = vand.u32 4294901760, %v2816_v2  ;;  %2783 = vmatpush.msrb.mxu0 %v2782_v19 }
0x102d   :  { %2818 = vmatpush.msrb.mxu1 %v2817_v17 }
0x1086   :  { %v2513_v32 = vpop.permute.xlu0 %2512 }
0x1087   :  { %v2515_v25 = vmul.f32 %v2513_v32, %v2507_v12  ;;  %v2756_v32 = vld [vmem:[%s3712_s4] sm:$0xff] }
0x1089   :  { %2517 = vrot.lane.b32.xlu1 %v2515_v25, %s3135_s3  ;;  %v2784_v25 = vand.u32 4294901760, %v2756_v32 }
0x108b   :  { %2785 = vmatpush.msrb.mxu0 %v2784_v25 }
0x10fb   :  { %v2518_v9 = vpop.permute.xlu1 %2517 }
0x10fc   :  { %v2520_v52 = vadd.f32 %v2518_v9, %v2510_v50  ;;  %v2826_v9 = vsub.f32 %v2756_v32, %v2784_v25 }
0x10fe   :  { %3064 = vtanh.f32 %v2520_v52 }
0x1104   :  { %v3065_v11 = vpop.eup %3064 }
0x1105   :  { %2523 = vrot.lane.b32.xlu2 %v3065_v11, %s3135_s3  ;;  %v2827_v11 = vand.u32 4294901760, %v2826_v9 }
0x115f   :  { %v2524_v5 = vpop.permute.xlu2 %2523 }
0x1160   :  { %v2526_v51 = vmul.f32 %v2524_v5, %v2507_v12  ;;  %v2820_v12 = vsub.f32 %v2757_v63, %v2782_v19 }
0x1162   :  { %2529 = vrot.lane.b32.xlu0 %v2526_v51, %s3136_s11  ;;  %v2821_v50 = vand.u32 4294901760, %v2820_v12  ;;  %v2828_v51 = vsub.f32 %v2826_v9, %v2827_v11 }
0x11d4   :  { %v2530_v20 = vpop.permute.xlu0 %2529 }
0x11d5   :  { %v2531_v43 = vsel %vm484_vm1, %v2530_v20, 0  ;;  %v2829_v20 = vand.u32 4294901760, %v2828_v51 }
0x11d6   :  { %v2553_v30 = vand.u32 4294901760, %v2531_v43 }
0x11d8   :  { %v2554_v34 = vsub.f32 %v2531_v43, %v2553_v30  ;;  %2599 = vmatmul.f32.vlgmr.msrb.gmra.mxu3 %v2553_v30  ;;  %v2953_v43 = vld [vmem:[%s3709_s1] sm:$0xff]  ;;  %s3138_s1 = smov 127  }
0x11d9   :  { %2879 = vmatpush.msrb.mxu3 %v2778_v26 }
0x11da   :  { %v2555_v18 = vand.u32 4294901760, %v2554_v34  ;;  %2629 = vmatmul.f32.vlgmr.msra.gmra.mxu0 %v2554_v34 }
0x11db   :  { %2881 = vmatpush.msrb.mxu3 %v2780_v27  ;;  %2908 = vmatpush.msra.mxu0 %v2809_v6 }
0x11dc   :  { %v2556_v35 = vsub.f32 %v2554_v34, %v2555_v18  ;;  %2656 = vmatmul.f32.vlgmr.msra.gmra.mxu1 %v2555_v18 }
0x11dd   :  { %2883 = vmatpush.msrb.mxu3 %v2782_v19  ;;  %2912 = vmatpush.msra.mxu0 %v2815_v8 }
0x11de   :  { %v2557_v37 = vand.u32 4294901760, %v2556_v35 }
0x11df   :  { %2885 = vmatpush.msrb.mxu3 %v2784_v25  ;;  %2916 = vmatpush.msra.mxu0 %v2821_v50 }
0x11e0   :  { %2558 = vmatmul.f32.vlgmr.msrb.gmra.mxu2 %v2557_v37  ;;  %2714 = vmatmul.f32.vlgmr.msra.gmra.mxu3 %v2553_v30 }
0x11e1   :  { %2850 = vmatpush.msrb.mxu2 %v2808_v23  ;;  %2920 = vmatpush.msra.mxu0 %v2827_v11 }
0x11e3   :  { %2853 = vmatpush.msrb.mxu2 %v2814_v28 }
0x11e5   :  { %2856 = vmatpush.msrb.mxu2 %v2820_v12 }
0x11e7   :  { %2859 = vmatpush.msrb.mxu2 %v2826_v9 }
0x11e8   :  { %2689 = vmatmul.f32.vlgmr.msra.gmra.mxu2 %v2553_v30 }
0x1257   :  { %v2630_v49 = vpop.f32.mrf.mxu0 }
0x1259   :  { %v2657_v55 = vpop.f32.mrf.mxu1 }
0x125b   :  { %v2600_v33 = vpop.f32.mrf.mxu3 }
0x1263   :  { %v2559_v38 = vpop.f32.mrf.mxu2  ;;  %v2715_v57 = vpop.f32.mrf.mxu3 }
0x1264   :  { %v2601_v29 = vadd.f32 %v2600_v33, %v2559_v38 }
0x1266   :  { %v2631_v53 = vadd.f32 %v2630_v49, %v2601_v29  ;;  %v3078_v29 = vld [vmem:[%s3713_s5] sm:$0x7]  ;;  %s3140_s5 = smov [#allocation6]  }
0x1267   :  { %v2760_v49 = vperm.slane %v3078_v29, 2  ;;  %s2978_s23 = sshll.u32 %s3140_s5, 4  ;;  %s2979_s23 = int_to_ptr.vmem [resolvable:$true] %s2978_s23 }
0x1268   :  { %v2658_v42 = vadd.f32 %v2657_v55, %v2631_v53 }
0x126b   :  { %v2690_v47 = vpop.f32.mrf.mxu2 }
0x126c   :  { %v2691_v40 = vadd.f32 %v2690_v47, %v2658_v42 }
0x126e   :  { %v2716_v45 = vadd.f32 %v2715_v57, %v2691_v40 }
0x1270   :  { %v2718_v48 = vadd.f32 %v2716_v45, %v3478_v31 }
0x1272   :  { %3066 = vtanh.f32 %v2718_v48  ;;  %v2997_v15 = vmul.f32 -1.442695, %v2718_v48 }
0x1274   :  { %3068 = vpow2.f32 %v2997_v15 }
0x1278   :  { %v3067_v56 = vpop.eup %3066 }
0x1279   :  { %2741 = vrot.lane.b32.xlu1 %v3067_v56, %s3135_s3 }
0x127a   :  { %v3069_v36 = vpop.eup %3068 }
0x127b   :  { %v2722_v58 = vadd.f32 1.0, %v3069_v36 }
0x127d   :  { %3070 = vrcp.f32 %v2722_v58  ;;  %v2734_v0 = vand.u32 2147483648, %v2722_v58  ;;  %vm2728_vm0 = vweird.f32 %v2722_v58  ;;  %v2732_v44 = vand.u32 2147483647, %v2722_v58 }
0x127f   :  { %v2735_v60 = vor.u32 1.1754944e-38, %v2734_v0  ;;  %vm2733_vm3 = vcmp.eq.f32.partialorder %v2732_v44, 8.507059e+37 }
0x1283   :  { %v3071_v59 = vpop.eup %3070 }
0x1284   :  { %v2724_v10 = vmul.f32 %v3071_v59, %v2722_v58  ;;  %vm2729_vm15 = vweird.f32 %v3071_v59 }
0x1285   :  { %vm2730_vm2 = vmor %vm2728_vm0, %vm2729_vm15 }
0x1286   :  { %v2725_v39 = vsub.f32 1.0, %v2724_v10 }
0x1288   :  { %v2726_v62 = vmul.f32 %v3071_v59, %v2725_v39 }
0x128a   :  { %v2727_v7 = vadd.f32 %v3071_v59, %v2726_v62 }
0x128c   :  { %v2731_v31 = vsel %vm2730_vm2, %v3071_v59, %v2727_v7  ;;  %v3139_v7 = vmov 0  }
0x128d   :  { %v2736_v16 = vsel %vm2733_vm3, %v2735_v60, %v2731_v31  ;;  %3008 = vset.pattern.permute.xlu1 %v3139_v7  ;;  %3009 = vset.pattern.permute.xlu0 %v3139_v7 }
0x128e   :  { %v2739_v1 = vmul.f32 %v2736_v16, %v2520_v52  ;;  %v2822_v52 = vsub.f32 %v2820_v12, %v2821_v50 }
0x1290   :  { %v2823_v5 = vand.u32 4294901760, %v2822_v52 }
0x1292   :  { %2824 = vmatpush.msrb.mxu1 %v2823_v5 }
0x1294   :  { %2830 = vmatpush.msrb.mxu1 %v2829_v20 }
0x1296   :  { %2939 = vmatpush.msra.mxu1 %v2778_v26 }
0x1298   :  { %2941 = vmatpush.msra.mxu1 %v2780_v27 }
0x129a   :  { %2943 = vmatpush.msra.mxu1 %v2782_v19 }
0x129c   :  { %2945 = vmatpush.msra.mxu1 %v2784_v25 }
0x12eb   :  { %v2742_v46 = vpop.permute.xlu1 %2741 }
0x12ec   :  { %v2744_v54 = vmul.f32 %v2742_v46, %v2736_v16 }
0x12ee   :  { %2746 = vrot.lane.b32.xlu2 %v2744_v54, %s3135_s3 }
0x12f6   :  { %2955 = vrot.lane.b32.xlu2 %v2953_v43, %s3137_s20 }
0x1348   :  { %v2747_v22 = vpop.permute.xlu2 %2746 }
0x1349   :  { %v2749_v61 = vadd.f32 %v2747_v22, %v2739_v1 }
0x134b   :  { %3072 = vtanh.f32 %v2749_v61 }
0x1350   :  { %v2956_v10 = vpop.permute.xlu2 %2955 }
0x1351   :  { %v3073_v24 = vpop.eup %3072 }
0x1352   :  { %2752 = vrot.lane.b32.xlu0 %v3073_v24, %s3135_s3 }
0x13c4   :  { %v2753_v3 = vpop.permute.xlu0 %2752 }
0x13c5   :  { %v2755_v21 = vmul.f32 %v2753_v3, %v2736_v16 }
0x13c7   :  { %2762 = vrot.lane.b32.xlu1 %v2755_v21, %s3136_s11 }
0x1439   :  { %v2763_v30 = vpop.permute.xlu1 %2762 }
0x143a   :  { %v2764_v34 = vsel %vm484_vm1, %v2763_v30, 0 }
0x143b   :  { %v2786_v18 = vand.u32 4294901760, %v2764_v34 }
0x143d   :  { %v2787_v35 = vsub.f32 %v2764_v34, %v2786_v18  ;;  %2832 = vmatmul.f32.vlgmr.msrb.gmra.mxu1 %v2786_v18 }
0x143f   :  { %v2788_v37 = vand.u32 4294901760, %v2787_v35  ;;  %2862 = vmatmul.f32.vlgmr.msrb.gmra.mxu2 %v2787_v35 }
0x1441   :  { %v2789_v33 = vsub.f32 %v2787_v35, %v2788_v37  ;;  %2889 = vmatmul.f32.vlgmr.msrb.gmra.mxu3 %v2788_v37 }
0x1443   :  { %v2790_v38 = vand.u32 4294901760, %v2789_v33 }
0x1445   :  { %2791 = vmatmul.f32.vlgmr.msrb.gmra.mxu0 %v2790_v38  ;;  %2947 = vmatmul.f32.vlgmr.msra.gmra.mxu1 %v2786_v18 }
0x144d   :  { %2922 = vmatmul.f32.vlgmr.msra.gmra.mxu0 %v2786_v18 }
0x14ba   :  { %v2833_v53 = vpop.f32.mrf.mxu1 }
0x14c2   :  { %v2792_v55 = vpop.f32.mrf.mxu0  ;;  %v2863_v40 = vpop.f32.mrf.mxu2 }
0x14c3   :  { %v2793_v42 = vadd.f32 %v2792_v55, %v2760_v49  ;;  %v2948_v36 = vpop.f32.mrf.mxu1 }
0x14c4   :  { %v2890_v45 = vpop.f32.mrf.mxu3 }
0x14c5   :  { %v2834_v47 = vadd.f32 %v2833_v53, %v2793_v42 }
0x14c7   :  { %v2864_v57 = vadd.f32 %v2863_v40, %v2834_v47 }
0x14c9   :  { %v2891_v48 = vadd.f32 %v2890_v45, %v2864_v57 }
0x14ca   :  { %v2923_v56 = vpop.f32.mrf.mxu0 }
0x14cb   :  { %v2924_v15 = vadd.f32 %v2923_v56, %v2891_v48 }
0x14cd   :  { %v2949_v58 = vadd.f32 %v2948_v36, %v2924_v15 }
0x14cf   :  { %v2951_v59 = vmul.f32 1.442695, %v2949_v58 }
0x14d1   :  { %3074 = vpow2.f32 %v2951_v59 }
0x14d7   :  { %v3075_v39 = vpop.eup %3074 }
0x14d8   :  { %v2958_v62 = vmul.f32 %v3075_v39, %v2956_v10 }
0x14da   :  { %2960 = vrot.lane.b32.xlu0 %v2958_v62, %s3138_s1 }
0x154c   :  { %v2961_v0 = vpop.permute.xlu0 %2960 }
0x154d   :  { %v2963_v44 = vadd.f32 %v2961_v0, %v2949_v58 }
0x154f   :  { %3076 = vtanh.f32 %v2963_v44 }
0x1555   :  { %v3077_v31 = vpop.eup %3076 }
0x1556   :  { %v2965_v60 = vadd.f32 1.0, %v3077_v31 }
0x1558   :  { %v2966_v46 = vmul.f32 0.5, %v2965_v60 }
0x155a   :  { %2969 = vperm.xlu1 %3008, %v2966_v46  }
0x15cc   :  { %v2970_v16 = vpop.permute.xlu1 %2969 }
0x15cd   :  { %2972 = vst [vmem:[#allocation6] sm:$0xff] %v2970_v16 }
0x15ce   :  { %2983 = dma.vmem_to_hbm [thread:$0]  %s2979_s23, 128, %s2981_s26, [#allocation5]  }
0x15cf   :  { %3129 = dma.done.wait [#allocation5], 128  }
0x15d0   :  { %3130 = vsyncadd [#allocation5], 4294967168 }
0x15d1   :  { %2988 = vsyncpa [#allocation4], 1 }
0x15d2   :  { %2989 = vsyncpa [#allocation5], 1 }

</bundles_post_ra>
